<compile_context>
chip_gen: v5e
topology: v5e:2x2
jax: 0.10.0
libtpu: 0.0.40
codegen_flags: <defaults>
</compile_context>

<pallas_src>
import functools

import jax
import jax.numpy as jnp
from jax.experimental import pallas as pl
from jax.experimental.pallas import tpu as pltpu

LANES = 128


def _round_up(n, m):
    return ((n + m - 1) // m) * m


# ------------------------------ fused kernel --------------------------------

def _tcn_fused_kernel(x_ref, w1_ref, b1_ref, w2_ref, b2_ref,
                      wd_ref, bd_ref, wdec_ref, bdec_ref,
                      o_ref, pad_ref, *,
                      T, C, K, num_levels, halo, dec_pad, has_downsample):
    """Whole TCN autoencoder forward for one batch element, entirely in VMEM.

    x_ref:   (1, T, C) f32 input (channels zero-padded to C on the host)
    w*_ref:  bf16 weights, taps stacked row-wise -> (..., K*C, C)
    b*_ref:  f32 biases (..., 1, C)
    o_ref:   (1, T, C) f32 output (real channels in the leading lanes)
    pad_ref: (halo + T + dec_pad, C) bf16 scratch; rows outside [halo, halo+T)
             stay zero and supply the causal / symmetric conv padding.
    """
    pad_ref[...] = jnp.zeros_like(pad_ref)

    def conv(base, dil, w, b):
        # One fat MXU matmul per conv: concat the K dilated windows into a
        # (T, K*C) bf16 operand and contract against the (K*C, C) weight.
        xcat = jnp.concatenate(
            [pad_ref[pl.ds(base + j * dil, T), :] for j in range(K)], axis=-1)
        return jnp.dot(xcat, w, preferred_element_type=jnp.float32) + b

    # Load the batch element.  h carries the exact f32 residual across levels.
    h = x_ref[0].astype(jnp.float32)                          # (T, C)
    pad_ref[pl.ds(halo, T), :] = x_ref[0].astype(jnp.bfloat16)

    # ----- encoder: stack of TemporalBlocks (causal dilated convs + residual)
    for lvl in range(num_levels):
        dil = 2 ** lvl
        base = halo - (K - 1) * dil            # causal left padding of (K-1)*dil

        # Residual branch (reads pad_ref while it still holds this level input).
        if lvl == 0 and has_downsample:
            res = (jnp.dot(pad_ref[pl.ds(halo, T), :], wd_ref[...],
                           preferred_element_type=jnp.float32) + bd_ref[...])
        else:
            res = h

        out1 = jnp.maximum(conv(base, dil, w1_ref[lvl], b1_ref[lvl]), 0.0)
        # TODO(synk): nn.Dropout is treated as inference-mode identity.
        pad_ref[pl.ds(halo, T), :] = out1.astype(jnp.bfloat16)

        out2 = jnp.maximum(conv(base, dil, w2_ref[lvl], b2_ref[lvl]), 0.0)
        h = jnp.maximum(out2 + res, 0.0)                       # f32 epilogue
        pad_ref[pl.ds(halo, T), :] = h.astype(jnp.bfloat16)

    # ----- decoder: ConvTranspose1d(latent, in, K, stride=1, padding=1)
    # == conv with flipped taps (flip done on the host) and (K-2)-wide
    # symmetric zero padding, supplied by the zero rows around the activation.
    dec = conv(halo - dec_pad, 1, wdec_ref[...], bdec_ref[...])
    o_ref[0] = dec.astype(o_ref.dtype)


# ------------------------------ host wrapper ---------------------------------

def tcn_autoencoder_forward(packed, x, *, kernel_size=3, latent=64):
    """x: (B, T, input_size) f32 -> (B, T, input_size) f32."""
    B, T, in_size = x.shape
    K = kernel_size
    L, KC, C = packed["W1"].shape
    assert KC == K * C

    max_p = (K - 1) * (2 ** (L - 1))     # largest causal pad in the stack
    halo = _round_up(max_p, 16)          # bf16 sublane-tile aligned activation rows
    dec_pad = K - 2                      # decoder's symmetric pad (module uses padding=1)
    Tp = halo + T + dec_pad

    # Lane-dense layout: pad channels to C (=128) once, outside the kernel.
    if in_size < C:
        x = jnp.pad(x, ((0, 0), (0, 0), (0, C - in_size)))

    kern = functools.partial(
        _tcn_fused_kernel, T=T, C=C, K=K, num_levels=L, halo=halo,
        dec_pad=dec_pad, has_downsample=(in_size != latent))

    def wspec(shape):
        return pl.BlockSpec(shape, lambda b: (0,) * len(shape))

    out = pl.pallas_call(
        kern,
        out_shape=jax.ShapeDtypeStruct((B, T, C), jnp.float32),
        grid_spec=pltpu.PrefetchScalarGridSpec(
            num_scalar_prefetch=0,
            grid=(B,),   # NOTE: add a halo'd time-tile axis for production T.
            in_specs=[
                pl.BlockSpec((1, T, C), lambda b: (b, 0, 0)),   # x
                wspec((L, KC, C)), wspec((L, 1, C)),            # W1, B1
                wspec((L, KC, C)), wspec((L, 1, C)),            # W2, B2
                wspec((C, C)), wspec((1, C)),                   # Wd, Bd
                wspec((KC, C)), wspec((1, C)),                  # Wdec, Bdec
            ],
            out_specs=pl.BlockSpec((1, T, C), lambda b: (b, 0, 0)),
            scratch_shapes=[pltpu.VMEM((Tp, C), jnp.bfloat16)],
        ),
        compiler_params=pltpu.CompilerParams(
            dimension_semantics=("parallel",)),
    )(x, packed["W1"], packed["B1"], packed["W2"], packed["B2"],
      packed["Wd"], packed["Bd"], packed["Wdec"], packed["Bdec"])
    return out[:, :, :in_size]


# --------------------------- parameter handling ------------------------------

def init_params(key, input_size, latent_size, num_levels, kernel_size):
    """Synthetic params in PyTorch layout (Conv1d: (cout,cin,K); CT1d: (cin,cout,K))."""
    params = {"levels": []}
    cin = input_size
    for _ in range(num_levels):
        cout = latent_size
        key, k1, k2, k3, k4, k5, k6 = jax.random.split(key, 7)
        lvl = {
            "conv1_w": jax.random.normal(k1, (cout, cin, kernel_size), jnp.float32)
                       * (2.0 / (cin * kernel_size)) ** 0.5,
            "conv1_b": jax.random.normal(k2, (cout,), jnp.float32) * 0.05,
            "conv2_w": jax.random.normal(k3, (cout, cout, kernel_size), jnp.float32)
                       * (2.0 / (cout * kernel_size)) ** 0.5,
            "conv2_b": jax.random.normal(k4, (cout,), jnp.float32) * 0.05,
        }
        if cin != cout:
            lvl["down_w"] = jax.random.normal(k5, (cout, cin, 1), jnp.float32) * (2.0 / cin) ** 0.5
            lvl["down_b"] = jax.random.normal(k6, (cout,), jnp.float32) * 0.05
        params["levels"].append(lvl)
        cin = cout
    key, k7, k8 = jax.random.split(key, 3)
    params["dec_w"] = (jax.random.normal(k7, (latent_size, input_size, kernel_size), jnp.float32)
                       * (1.0 / (latent_size * kernel_size)) ** 0.5)
    params["dec_b"] = jax.random.normal(k8, (input_size,), jnp.float32) * 0.05
    return params


def pack_params(pt, *, kernel_size, in_size, latent):
    """PyTorch-layout params -> padded / stacked / bf16 kernel layout.

    Conv1d weight (cout, cin, K)          -> taps (K, cin, cout)
    ConvTranspose1d weight (cin, cout, K) -> taps[j] = W[:, :, K-1-j]  (explicit flip)
    Taps are zero-padded to (K, C, C) and flattened to (K*C, C) so one
    (T, K*C) @ (K*C, C) matmul performs the whole conv.
    """
    K = kernel_size
    C = _round_up(max(in_size, latent), LANES)

    def pack_conv(w_tap):                       # (k, cin, cout) -> (k*C, C) bf16
        k, cin, cout = w_tap.shape
        w = jnp.zeros((k, C, C), jnp.float32).at[:, :cin, :cout].set(w_tap)
        return w.reshape(k * C, C).astype(jnp.bfloat16)

    def pack_bias(b):                           # (cout,) -> (1, C) f32
        return jnp.zeros((1, C), jnp.float32).at[0, :b.shape[0]].set(b)

    W1, B1, W2, B2 = [], [], [], []
    for lvl in pt["levels"]:
        W1.append(pack_conv(jnp.transpose(lvl["conv1_w"], (2, 1, 0))))
        B1.append(pack_bias(lvl["conv1_b"]))
        W2.append(pack_conv(jnp.transpose(lvl["conv2_w"], (2, 1, 0))))
        B2.append(pack_bias(lvl["conv2_b"]))

    lvl0 = pt["levels"][0]
    if "down_w" in lvl0:
        Wd = pack_conv(jnp.transpose(lvl0["down_w"], (2, 1, 0)))   # (C, C)
        Bd = pack_bias(lvl0["down_b"])
    else:
        Wd = jnp.zeros((C, C), jnp.bfloat16)
        Bd = jnp.zeros((1, C), jnp.float32)

    # ConvTranspose1d -> equivalent conv: flip along K, then tap-major.
    dec_taps = jnp.transpose(jnp.flip(pt["dec_w"], axis=2), (2, 0, 1))
    Wdec = pack_conv(dec_taps)
    Bdec = pack_bias(pt["dec_b"])

    return {"W1": jnp.stack(W1), "B1": jnp.stack(B1),
            "W2": jnp.stack(W2), "B2": jnp.stack(B2),
            "Wd": Wd, "Bd": Bd, "Wdec": Wdec, "Bdec": Bdec}


# --------------------------- pure-JAX reference -------------------------------

def ref_forward(pt, x, *, kernel_size=3):
    """Independent reference (bf16 matmul inputs, f32 accumulate, f32 epilogue)."""
    K = kernel_size

    def conv1d(xin, w_pt, b, pad, dil):
        w = jnp.transpose(w_pt, (2, 1, 0)).astype(jnp.bfloat16)   # (K, cin, cout)
        y = jax.lax.conv_general_dilated(
            xin.astype(jnp.bfloat16), w, window_strides=(1,), padding=[pad],
            rhs_dilation=(dil,), dimension_numbers=("NWC", "WIO", "NWC"),
            preferred_element_type=jnp.float32)
        return y + b[None, None, :]

    h = x.astype(jnp.float32)
    for i, lvl in enumerate(pt["levels"]):
        d = 2 ** i
        p = (K - 1) * d
        o1 = jax.nn.relu(conv1d(h, lvl["conv1_w"], lvl["conv1_b"], (p, 0), d))
        o2 = jax.nn.relu(conv1d(o1, lvl["conv2_w"], lvl["conv2_b"], (p, 0), d))
        res = conv1d(h, lvl["down_w"], lvl["down_b"], (0, 0), 1) if "down_w" in lvl else h
        h = jax.nn.relu(o2 + res)

    # ConvTranspose1d via its scatter (adjoint-of-conv) definition, padding=1.
    w = pt["dec_w"]                         # (latent, in_size, K)
    B, T, _ = h.shape
    z = jnp.zeros((B, T + K - 1, w.shape[1]), jnp.float32)
    hb = h.astype(jnp.bfloat16)
    for k in range(K):
        zk = jnp.einsum("btc,cd->btd", hb, w[:, :, k].astype(jnp.bfloat16),
                        preferred_element_type=jnp.float32)
        z = z.at[:, k:k + T, :].add(zk)
    return z[:, 1:1 + T, :] + pt["dec_b"][None, None, :]


# ---------------------------------- main --------------------------------------

if __name__ == "__main__":
    B, T = 2, 16
    input_size, latent_size, num_levels, K = 8, 32, 3, 3

    key = jax.random.PRNGKey(0)
    kx, kp = jax.random.split(key)
    x = jax.random.normal(kx, (B, T, input_size), jnp.float32)

    pt_params = init_params(kp, input_size, latent_size, num_levels, K)
    packed = pack_params(pt_params, kernel_size=K, in_size=input_size, latent=latent_size)

    fwd = jax.jit(functools.partial(tcn_autoencoder_forward,
                                    kernel_size=K, latent=latent_size))
    out = jax.block_until_ready(fwd(packed, x))

    ref = ref_forward(pt_params, x, kernel_size=K)
    assert out.shape == (B, T, input_size), out.shape
    err = float(jnp.max(jnp.abs(out - ref)))
    assert err < 1e-2, f"mismatch vs reference: max abs err = {err}"

    print("KERNEL_OK")
</pallas_src>

<mosaic_0001>
module attributes {stable_mosaic.version = 11 : i64} {
  func.func @_tcn_fused_kernel(%arg0: i32, %arg1: memref<1x16x128xf32, #tpu.memory_space<vmem>>, %arg2: memref<3x384x128xbf16, #tpu.memory_space<vmem>>, %arg3: memref<3x1x128xf32, #tpu.memory_space<vmem>>, %arg4: memref<3x384x128xbf16, #tpu.memory_space<vmem>>, %arg5: memref<3x1x128xf32, #tpu.memory_space<vmem>>, %arg6: memref<128x128xbf16, #tpu.memory_space<vmem>>, %arg7: memref<1x128xf32, #tpu.memory_space<vmem>>, %arg8: memref<384x128xbf16, #tpu.memory_space<vmem>>, %arg9: memref<1x128xf32, #tpu.memory_space<vmem>>, %arg10: memref<1x16x128xf32, #tpu.memory_space<vmem>>, %arg11: memref<33x128xbf16, #tpu.memory_space<vmem>>) attributes {dimension_semantics = [#tpu.dimension_semantics<parallel>], iteration_bounds = array<i64: 2>, scalar_prefetch = 0 : i64, scratch_operands = 1 : i64, tpu.core_type = #tpu.core_type<tc>, window_params = [{transform_indices = @transform_0, window_bounds = array<i64: 1, 16, 128>}, {pipeline_mode = #tpu.pipeline_mode<synchronous>, transform_indices = @transform_1, window_bounds = array<i64: 3, 384, 128>}, {pipeline_mode = #tpu.pipeline_mode<synchronous>, transform_indices = @transform_2, window_bounds = array<i64: 3, 1, 128>}, {pipeline_mode = #tpu.pipeline_mode<synchronous>, transform_indices = @transform_3, window_bounds = array<i64: 3, 384, 128>}, {pipeline_mode = #tpu.pipeline_mode<synchronous>, transform_indices = @transform_4, window_bounds = array<i64: 3, 1, 128>}, {pipeline_mode = #tpu.pipeline_mode<synchronous>, transform_indices = @transform_5, window_bounds = array<i64: 128, 128>}, {pipeline_mode = #tpu.pipeline_mode<synchronous>, transform_indices = @transform_6, window_bounds = array<i64: 1, 128>}, {pipeline_mode = #tpu.pipeline_mode<synchronous>, transform_indices = @transform_7, window_bounds = array<i64: 384, 128>}, {pipeline_mode = #tpu.pipeline_mode<synchronous>, transform_indices = @transform_8, window_bounds = array<i64: 1, 128>}, {transform_indices = @transform_9, window_bounds = array<i64: 1, 16, 128>}]} {
    %cst = arith.constant 0.000000e+00 : bf16
    %0 = vector.broadcast %cst : bf16 to vector<33x128xbf16>
    %c0 = arith.constant 0 : index
    %c0_0 = arith.constant 0 : index
    %1 = vector.load %arg11[%c0, %c0_0] : memref<33x128xbf16, #tpu.memory_space<vmem>>, vector<33x128xbf16>
    tpu.vector_store %arg11[%c0, %c0_0], %0 {strides = array<i32>} : memref<33x128xbf16, #tpu.memory_space<vmem>>, vector<33x128xbf16>,
    %c0_1 = arith.constant 0 : index
    %c0_2 = arith.constant 0 : index
    %c0_3 = arith.constant 0 : index
    %2 = vector.load %arg1[%c0_1, %c0_2, %c0_3] : memref<1x16x128xf32, #tpu.memory_space<vmem>>, vector<1x16x128xf32>
    %3 = vector.shape_cast %2 : vector<1x16x128xf32> to vector<16x128xf32>
    %4 = arith.truncf %3 : vector<16x128xf32> to vector<16x128xbf16>
    %c16 = arith.constant 16 : index
    %c0_4 = arith.constant 0 : index
    %5 = vector.load %arg11[%c16, %c0_4] : memref<33x128xbf16, #tpu.memory_space<vmem>>, vector<16x128xbf16>
    tpu.vector_store %arg11[%c16, %c0_4], %4 {strides = array<i32>} : memref<33x128xbf16, #tpu.memory_space<vmem>>, vector<16x128xbf16>,
    %c16_5 = arith.constant 16 : index
    %c0_6 = arith.constant 0 : index
    %6 = vector.load %arg11[%c16_5, %c0_6] : memref<33x128xbf16, #tpu.memory_space<vmem>>, vector<16x128xbf16>
    %c0_7 = arith.constant 0 : index
    %c0_8 = arith.constant 0 : index
    %7 = vector.load %arg6[%c0_7, %c0_8] : memref<128x128xbf16, #tpu.memory_space<vmem>>, vector<128x128xbf16>
    %cst_9 = arith.constant dense<0.000000e+00> : vector<16x128xf32>
    %8 = tpu.matmul %6, %7, %cst_9 {dimension_numbers = #tpu.dot_dimension_numbers<[1], [0], [0], [1], [0, 0, 1, 1], [], []>} : vector<16x128xbf16>, vector<128x128xbf16>, vector<16x128xf32> -> vector<16x128xf32>
    %c0_10 = arith.constant 0 : index
    %c0_11 = arith.constant 0 : index
    %9 = vector.load %arg7[%c0_10, %c0_11] : memref<1x128xf32, #tpu.memory_space<vmem>>, vector<1x128xf32>
    %10 = vector.broadcast %9 : vector<1x128xf32> to vector<16x128xf32>
    %11 = arith.addf %8, %10 : vector<16x128xf32>
    %c0_12 = arith.constant 0 : index
    %c0_13 = arith.constant 0 : index
    %c0_14 = arith.constant 0 : index
    %12 = vector.load %arg2[%c0_12, %c0_13, %c0_14] : memref<3x384x128xbf16, #tpu.memory_space<vmem>>, vector<1x384x128xbf16>
    %13 = vector.shape_cast %12 : vector<1x384x128xbf16> to vector<384x128xbf16>
    %c0_15 = arith.constant 0 : index
    %c0_16 = arith.constant 0 : index
    %c0_17 = arith.constant 0 : index
    %14 = vector.load %arg3[%c0_15, %c0_16, %c0_17] : memref<3x1x128xf32, #tpu.memory_space<vmem>>, vector<1x1x128xf32>
    %15 = vector.shape_cast %14 : vector<1x1x128xf32> to vector<1x128xf32>
    %c14 = arith.constant 14 : index
    %c0_18 = arith.constant 0 : index
    %16 = vector.load %arg11[%c14, %c0_18] : memref<33x128xbf16, #tpu.memory_space<vmem>>, vector<16x128xbf16>
    %c15 = arith.constant 15 : index
    %c0_19 = arith.constant 0 : index
    %17 = vector.load %arg11[%c15, %c0_19] : memref<33x128xbf16, #tpu.memory_space<vmem>>, vector<16x128xbf16>
    %c16_20 = arith.constant 16 : index
    %c0_21 = arith.constant 0 : index
    %18 = vector.load %arg11[%c16_20, %c0_21] : memref<33x128xbf16, #tpu.memory_space<vmem>>, vector<16x128xbf16>
    %19 = tpu.concatenate %16, %17, %18 in 1 : vector<16x128xbf16>, vector<16x128xbf16>, vector<16x128xbf16> -> vector<16x384xbf16>
    %cst_22 = arith.constant dense<0.000000e+00> : vector<16x128xf32>
    %20 = tpu.matmul %19, %13, %cst_22 {dimension_numbers = #tpu.dot_dimension_numbers<[1], [0], [0], [1], [0, 0, 1, 1], [], []>} : vector<16x384xbf16>, vector<384x128xbf16>, vector<16x128xf32> -> vector<16x128xf32>
    %21 = vector.broadcast %15 : vector<1x128xf32> to vector<16x128xf32>
    %22 = arith.addf %20, %21 : vector<16x128xf32>
    %cst_23 = arith.constant 0.000000e+00 : f32
    %23 = vector.broadcast %cst_23 : f32 to vector<16x128xf32>
    %24 = arith.maximumf %22, %23 : vector<16x128xf32>
    %25 = arith.truncf %24 : vector<16x128xf32> to vector<16x128xbf16>
    %c16_24 = arith.constant 16 : index
    %c0_25 = arith.constant 0 : index
    %26 = vector.load %arg11[%c16_24, %c0_25] : memref<33x128xbf16, #tpu.memory_space<vmem>>, vector<16x128xbf16>
    tpu.vector_store %arg11[%c16_24, %c0_25], %25 {strides = array<i32>} : memref<33x128xbf16, #tpu.memory_space<vmem>>, vector<16x128xbf16>,
    %c0_26 = arith.constant 0 : index
    %c0_27 = arith.constant 0 : index
    %c0_28 = arith.constant 0 : index
    %27 = vector.load %arg4[%c0_26, %c0_27, %c0_28] : memref<3x384x128xbf16, #tpu.memory_space<vmem>>, vector<1x384x128xbf16>
    %28 = vector.shape_cast %27 : vector<1x384x128xbf16> to vector<384x128xbf16>
    %c0_29 = arith.constant 0 : index
    %c0_30 = arith.constant 0 : index
    %c0_31 = arith.constant 0 : index
    %29 = vector.load %arg5[%c0_29, %c0_30, %c0_31] : memref<3x1x128xf32, #tpu.memory_space<vmem>>, vector<1x1x128xf32>
    %30 = vector.shape_cast %29 : vector<1x1x128xf32> to vector<1x128xf32>
    %c14_32 = arith.constant 14 : index
    %c0_33 = arith.constant 0 : index
    %31 = vector.load %arg11[%c14_32, %c0_33] : memref<33x128xbf16, #tpu.memory_space<vmem>>, vector<16x128xbf16>
    %c15_34 = arith.constant 15 : index
    %c0_35 = arith.constant 0 : index
    %32 = vector.load %arg11[%c15_34, %c0_35] : memref<33x128xbf16, #tpu.memory_space<vmem>>, vector<16x128xbf16>
    %c16_36 = arith.constant 16 : index
    %c0_37 = arith.constant 0 : index
    %33 = vector.load %arg11[%c16_36, %c0_37] : memref<33x128xbf16, #tpu.memory_space<vmem>>, vector<16x128xbf16>
    %34 = tpu.concatenate %31, %32, %33 in 1 : vector<16x128xbf16>, vector<16x128xbf16>, vector<16x128xbf16> -> vector<16x384xbf16>
    %cst_38 = arith.constant dense<0.000000e+00> : vector<16x128xf32>
    %35 = tpu.matmul %34, %28, %cst_38 {dimension_numbers = #tpu.dot_dimension_numbers<[1], [0], [0], [1], [0, 0, 1, 1], [], []>} : vector<16x384xbf16>, vector<384x128xbf16>, vector<16x128xf32> -> vector<16x128xf32>
    %36 = vector.broadcast %30 : vector<1x128xf32> to vector<16x128xf32>
    %37 = arith.addf %35, %36 : vector<16x128xf32>
    %cst_39 = arith.constant 0.000000e+00 : f32
    %38 = vector.broadcast %cst_39 : f32 to vector<16x128xf32>
    %39 = arith.maximumf %37, %38 : vector<16x128xf32>
    %40 = arith.addf %39, %11 : vector<16x128xf32>
    %cst_40 = arith.constant 0.000000e+00 : f32
    %41 = vector.broadcast %cst_40 : f32 to vector<16x128xf32>
    %42 = arith.maximumf %40, %41 : vector<16x128xf32>
    %43 = arith.truncf %42 : vector<16x128xf32> to vector<16x128xbf16>
    %c16_41 = arith.constant 16 : index
    %c0_42 = arith.constant 0 : index
    %44 = vector.load %arg11[%c16_41, %c0_42] : memref<33x128xbf16, #tpu.memory_space<vmem>>, vector<16x128xbf16>
    tpu.vector_store %arg11[%c16_41, %c0_42], %43 {strides = array<i32>} : memref<33x128xbf16, #tpu.memory_space<vmem>>, vector<16x128xbf16>,
    %c1 = arith.constant 1 : index
    %c0_43 = arith.constant 0 : index
    %c0_44 = arith.constant 0 : index
    %45 = vector.load %arg2[%c1, %c0_43, %c0_44] : memref<3x384x128xbf16, #tpu.memory_space<vmem>>, vector<1x384x128xbf16>
    %46 = vector.shape_cast %45 : vector<1x384x128xbf16> to vector<384x128xbf16>
    %c1_45 = arith.constant 1 : index
    %c0_46 = arith.constant 0 : index
    %c0_47 = arith.constant 0 : index
    %47 = vector.load %arg3[%c1_45, %c0_46, %c0_47] : memref<3x1x128xf32, #tpu.memory_space<vmem>>, vector<1x1x128xf32>
    %48 = vector.shape_cast %47 : vector<1x1x128xf32> to vector<1x128xf32>
    %c12 = arith.constant 12 : index
    %c0_48 = arith.constant 0 : index
    %49 = vector.load %arg11[%c12, %c0_48] : memref<33x128xbf16, #tpu.memory_space<vmem>>, vector<16x128xbf16>
    %c14_49 = arith.constant 14 : index
    %c0_50 = arith.constant 0 : index
    %50 = vector.load %arg11[%c14_49, %c0_50] : memref<33x128xbf16, #tpu.memory_space<vmem>>, vector<16x128xbf16>
    %c16_51 = arith.constant 16 : index
    %c0_52 = arith.constant 0 : index
    %51 = vector.load %arg11[%c16_51, %c0_52] : memref<33x128xbf16, #tpu.memory_space<vmem>>, vector<16x128xbf16>
    %52 = tpu.concatenate %49, %50, %51 in 1 : vector<16x128xbf16>, vector<16x128xbf16>, vector<16x128xbf16> -> vector<16x384xbf16>
    %cst_53 = arith.constant dense<0.000000e+00> : vector<16x128xf32>
    %53 = tpu.matmul %52, %46, %cst_53 {dimension_numbers = #tpu.dot_dimension_numbers<[1], [0], [0], [1], [0, 0, 1, 1], [], []>} : vector<16x384xbf16>, vector<384x128xbf16>, vector<16x128xf32> -> vector<16x128xf32>
    %54 = vector.broadcast %48 : vector<1x128xf32> to vector<16x128xf32>
    %55 = arith.addf %53, %54 : vector<16x128xf32>
    %cst_54 = arith.constant 0.000000e+00 : f32
    %56 = vector.broadcast %cst_54 : f32 to vector<16x128xf32>
    %57 = arith.maximumf %55, %56 : vector<16x128xf32>
    %58 = arith.truncf %57 : vector<16x128xf32> to vector<16x128xbf16>
    %c16_55 = arith.constant 16 : index
    %c0_56 = arith.constant 0 : index
    %59 = vector.load %arg11[%c16_55, %c0_56] : memref<33x128xbf16, #tpu.memory_space<vmem>>, vector<16x128xbf16>
    tpu.vector_store %arg11[%c16_55, %c0_56], %58 {strides = array<i32>} : memref<33x128xbf16, #tpu.memory_space<vmem>>, vector<16x128xbf16>,
    %c1_57 = arith.constant 1 : index
    %c0_58 = arith.constant 0 : index
    %c0_59 = arith.constant 0 : index
    %60 = vector.load %arg4[%c1_57, %c0_58, %c0_59] : memref<3x384x128xbf16, #tpu.memory_space<vmem>>, vector<1x384x128xbf16>
    %61 = vector.shape_cast %60 : vector<1x384x128xbf16> to vector<384x128xbf16>
    %c1_60 = arith.constant 1 : index
    %c0_61 = arith.constant 0 : index
    %c0_62 = arith.constant 0 : index
    %62 = vector.load %arg5[%c1_60, %c0_61, %c0_62] : memref<3x1x128xf32, #tpu.memory_space<vmem>>, vector<1x1x128xf32>
    %63 = vector.shape_cast %62 : vector<1x1x128xf32> to vector<1x128xf32>
    %c12_63 = arith.constant 12 : index
    %c0_64 = arith.constant 0 : index
    %64 = vector.load %arg11[%c12_63, %c0_64] : memref<33x128xbf16, #tpu.memory_space<vmem>>, vector<16x128xbf16>
    %c14_65 = arith.constant 14 : index
    %c0_66 = arith.constant 0 : index
    %65 = vector.load %arg11[%c14_65, %c0_66] : memref<33x128xbf16, #tpu.memory_space<vmem>>, vector<16x128xbf16>
    %c16_67 = arith.constant 16 : index
    %c0_68 = arith.constant 0 : index
    %66 = vector.load %arg11[%c16_67, %c0_68] : memref<33x128xbf16, #tpu.memory_space<vmem>>, vector<16x128xbf16>
    %67 = tpu.concatenate %64, %65, %66 in 1 : vector<16x128xbf16>, vector<16x128xbf16>, vector<16x128xbf16> -> vector<16x384xbf16>
    %cst_69 = arith.constant dense<0.000000e+00> : vector<16x128xf32>
    %68 = tpu.matmul %67, %61, %cst_69 {dimension_numbers = #tpu.dot_dimension_numbers<[1], [0], [0], [1], [0, 0, 1, 1], [], []>} : vector<16x384xbf16>, vector<384x128xbf16>, vector<16x128xf32> -> vector<16x128xf32>
    %69 = vector.broadcast %63 : vector<1x128xf32> to vector<16x128xf32>
    %70 = arith.addf %68, %69 : vector<16x128xf32>
    %cst_70 = arith.constant 0.000000e+00 : f32
    %71 = vector.broadcast %cst_70 : f32 to vector<16x128xf32>
    %72 = arith.maximumf %70, %71 : vector<16x128xf32>
    %73 = arith.addf %72, %42 : vector<16x128xf32>
    %cst_71 = arith.constant 0.000000e+00 : f32
    %74 = vector.broadcast %cst_71 : f32 to vector<16x128xf32>
    %75 = arith.maximumf %73, %74 : vector<16x128xf32>
    %76 = arith.truncf %75 : vector<16x128xf32> to vector<16x128xbf16>
    %c16_72 = arith.constant 16 : index
    %c0_73 = arith.constant 0 : index
    %77 = vector.load %arg11[%c16_72, %c0_73] : memref<33x128xbf16, #tpu.memory_space<vmem>>, vector<16x128xbf16>
    tpu.vector_store %arg11[%c16_72, %c0_73], %76 {strides = array<i32>} : memref<33x128xbf16, #tpu.memory_space<vmem>>, vector<16x128xbf16>,
    %c2 = arith.constant 2 : index
    %c0_74 = arith.constant 0 : index
    %c0_75 = arith.constant 0 : index
    %78 = vector.load %arg2[%c2, %c0_74, %c0_75] : memref<3x384x128xbf16, #tpu.memory_space<vmem>>, vector<1x384x128xbf16>
    %79 = vector.shape_cast %78 : vector<1x384x128xbf16> to vector<384x128xbf16>
    %c2_76 = arith.constant 2 : index
    %c0_77 = arith.constant 0 : index
    %c0_78 = arith.constant 0 : index
    %80 = vector.load %arg3[%c2_76, %c0_77, %c0_78] : memref<3x1x128xf32, #tpu.memory_space<vmem>>, vector<1x1x128xf32>
    %81 = vector.shape_cast %80 : vector<1x1x128xf32> to vector<1x128xf32>
    %c8 = arith.constant 8 : index
    %c0_79 = arith.constant 0 : index
    %82 = vector.load %arg11[%c8, %c0_79] : memref<33x128xbf16, #tpu.memory_space<vmem>>, vector<16x128xbf16>
    %c12_80 = arith.constant 12 : index
    %c0_81 = arith.constant 0 : index
    %83 = vector.load %arg11[%c12_80, %c0_81] : memref<33x128xbf16, #tpu.memory_space<vmem>>, vector<16x128xbf16>
    %c16_82 = arith.constant 16 : index
    %c0_83 = arith.constant 0 : index
    %84 = vector.load %arg11[%c16_82, %c0_83] : memref<33x128xbf16, #tpu.memory_space<vmem>>, vector<16x128xbf16>
    %85 = tpu.concatenate %82, %83, %84 in 1 : vector<16x128xbf16>, vector<16x128xbf16>, vector<16x128xbf16> -> vector<16x384xbf16>
    %cst_84 = arith.constant dense<0.000000e+00> : vector<16x128xf32>
    %86 = tpu.matmul %85, %79, %cst_84 {dimension_numbers = #tpu.dot_dimension_numbers<[1], [0], [0], [1], [0, 0, 1, 1], [], []>} : vector<16x384xbf16>, vector<384x128xbf16>, vector<16x128xf32> -> vector<16x128xf32>
    %87 = vector.broadcast %81 : vector<1x128xf32> to vector<16x128xf32>
    %88 = arith.addf %86, %87 : vector<16x128xf32>
    %cst_85 = arith.constant 0.000000e+00 : f32
    %89 = vector.broadcast %cst_85 : f32 to vector<16x128xf32>
    %90 = arith.maximumf %88, %89 : vector<16x128xf32>
    %91 = arith.truncf %90 : vector<16x128xf32> to vector<16x128xbf16>
    %c16_86 = arith.constant 16 : index
    %c0_87 = arith.constant 0 : index
    %92 = vector.load %arg11[%c16_86, %c0_87] : memref<33x128xbf16, #tpu.memory_space<vmem>>, vector<16x128xbf16>
    tpu.vector_store %arg11[%c16_86, %c0_87], %91 {strides = array<i32>} : memref<33x128xbf16, #tpu.memory_space<vmem>>, vector<16x128xbf16>,
    %c2_88 = arith.constant 2 : index
    %c0_89 = arith.constant 0 : index
    %c0_90 = arith.constant 0 : index
    %93 = vector.load %arg4[%c2_88, %c0_89, %c0_90] : memref<3x384x128xbf16, #tpu.memory_space<vmem>>, vector<1x384x128xbf16>
    %94 = vector.shape_cast %93 : vector<1x384x128xbf16> to vector<384x128xbf16>
    %c2_91 = arith.constant 2 : index
    %c0_92 = arith.constant 0 : index
    %c0_93 = arith.constant 0 : index
    %95 = vector.load %arg5[%c2_91, %c0_92, %c0_93] : memref<3x1x128xf32, #tpu.memory_space<vmem>>, vector<1x1x128xf32>
    %96 = vector.shape_cast %95 : vector<1x1x128xf32> to vector<1x128xf32>
    %c8_94 = arith.constant 8 : index
    %c0_95 = arith.constant 0 : index
    %97 = vector.load %arg11[%c8_94, %c0_95] : memref<33x128xbf16, #tpu.memory_space<vmem>>, vector<16x128xbf16>
    %c12_96 = arith.constant 12 : index
    %c0_97 = arith.constant 0 : index
    %98 = vector.load %arg11[%c12_96, %c0_97] : memref<33x128xbf16, #tpu.memory_space<vmem>>, vector<16x128xbf16>
    %c16_98 = arith.constant 16 : index
    %c0_99 = arith.constant 0 : index
    %99 = vector.load %arg11[%c16_98, %c0_99] : memref<33x128xbf16, #tpu.memory_space<vmem>>, vector<16x128xbf16>
    %100 = tpu.concatenate %97, %98, %99 in 1 : vector<16x128xbf16>, vector<16x128xbf16>, vector<16x128xbf16> -> vector<16x384xbf16>
    %cst_100 = arith.constant dense<0.000000e+00> : vector<16x128xf32>
    %101 = tpu.matmul %100, %94, %cst_100 {dimension_numbers = #tpu.dot_dimension_numbers<[1], [0], [0], [1], [0, 0, 1, 1], [], []>} : vector<16x384xbf16>, vector<384x128xbf16>, vector<16x128xf32> -> vector<16x128xf32>
    %102 = vector.broadcast %96 : vector<1x128xf32> to vector<16x128xf32>
    %103 = arith.addf %101, %102 : vector<16x128xf32>
    %cst_101 = arith.constant 0.000000e+00 : f32
    %104 = vector.broadcast %cst_101 : f32 to vector<16x128xf32>
    %105 = arith.maximumf %103, %104 : vector<16x128xf32>
    %106 = arith.addf %105, %75 : vector<16x128xf32>
    %cst_102 = arith.constant 0.000000e+00 : f32
    %107 = vector.broadcast %cst_102 : f32 to vector<16x128xf32>
    %108 = arith.maximumf %106, %107 : vector<16x128xf32>
    %109 = arith.truncf %108 : vector<16x128xf32> to vector<16x128xbf16>
    %c16_103 = arith.constant 16 : index
    %c0_104 = arith.constant 0 : index
    %110 = vector.load %arg11[%c16_103, %c0_104] : memref<33x128xbf16, #tpu.memory_space<vmem>>, vector<16x128xbf16>
    tpu.vector_store %arg11[%c16_103, %c0_104], %109 {strides = array<i32>} : memref<33x128xbf16, #tpu.memory_space<vmem>>, vector<16x128xbf16>,
    %c0_105 = arith.constant 0 : index
    %c0_106 = arith.constant 0 : index
    %111 = vector.load %arg8[%c0_105, %c0_106] : memref<384x128xbf16, #tpu.memory_space<vmem>>, vector<384x128xbf16>
    %c0_107 = arith.constant 0 : index
    %c0_108 = arith.constant 0 : index
    %112 = vector.load %arg9[%c0_107, %c0_108] : memref<1x128xf32, #tpu.memory_space<vmem>>, vector<1x128xf32>
    %c15_109 = arith.constant 15 : index
    %c0_110 = arith.constant 0 : index
    %113 = vector.load %arg11[%c15_109, %c0_110] : memref<33x128xbf16, #tpu.memory_space<vmem>>, vector<16x128xbf16>
    %c16_111 = arith.constant 16 : index
    %c0_112 = arith.constant 0 : index
    %114 = vector.load %arg11[%c16_111, %c0_112] : memref<33x128xbf16, #tpu.memory_space<vmem>>, vector<16x128xbf16>
    %c17 = arith.constant 17 : index
    %c0_113 = arith.constant 0 : index
    %115 = vector.load %arg11[%c17, %c0_113] : memref<33x128xbf16, #tpu.memory_space<vmem>>, vector<16x128xbf16>
    %116 = tpu.concatenate %113, %114, %115 in 1 : vector<16x128xbf16>, vector<16x128xbf16>, vector<16x128xbf16> -> vector<16x384xbf16>
    %cst_114 = arith.constant dense<0.000000e+00> : vector<16x128xf32>
    %117 = tpu.matmul %116, %111, %cst_114 {dimension_numbers = #tpu.dot_dimension_numbers<[1], [0], [0], [1], [0, 0, 1, 1], [], []>} : vector<16x384xbf16>, vector<384x128xbf16>, vector<16x128xf32> -> vector<16x128xf32>
    %118 = vector.broadcast %112 : vector<1x128xf32> to vector<16x128xf32>
    %119 = arith.addf %117, %118 : vector<16x128xf32>
    %c0_115 = arith.constant 0 : index
    %c0_116 = arith.constant 0 : index
    %c0_117 = arith.constant 0 : index
    %120 = vector.load %arg10[%c0_115, %c0_116, %c0_117] : memref<1x16x128xf32, #tpu.memory_space<vmem>>, vector<1x16x128xf32>
    %121 = vector.shape_cast %120 : vector<1x16x128xf32> to vector<16x128xf32>
    %122 = vector.shape_cast %119 : vector<16x128xf32> to vector<1x16x128xf32>
    tpu.vector_store %arg10[%c0_115, %c0_116, %c0_117], %122 {strides = array<i32>} : memref<1x16x128xf32, #tpu.memory_space<vmem>>, vector<1x16x128xf32>,
    return
  }
  func.func @transform_0(%arg0: i32) -> (i32, i32, i32) {
    %c0_i32 = arith.constant 0 : i32
    %c0_i32_0 = arith.constant 0 : i32
    %c0_i32_1 = arith.constant 0 : i32
    return %arg0, %c0_i32, %c0_i32_0 : i32, i32, i32
  }
  func.func @transform_1(%arg0: i32) -> (i32, i32, i32) {
    %c0_i32 = arith.constant 0 : i32
    %c0_i32_0 = arith.constant 0 : i32
    %c0_i32_1 = arith.constant 0 : i32
    %c0_i32_2 = arith.constant 0 : i32
    return %c0_i32, %c0_i32_0, %c0_i32_1 : i32, i32, i32
  }
  func.func @transform_2(%arg0: i32) -> (i32, i32, i32) {
    %c0_i32 = arith.constant 0 : i32
    %c0_i32_0 = arith.constant 0 : i32
    %c0_i32_1 = arith.constant 0 : i32
    %c0_i32_2 = arith.constant 0 : i32
    return %c0_i32, %c0_i32_0, %c0_i32_1 : i32, i32, i32
  }
  func.func @transform_3(%arg0: i32) -> (i32, i32, i32) {
    %c0_i32 = arith.constant 0 : i32
    %c0_i32_0 = arith.constant 0 : i32
    %c0_i32_1 = arith.constant 0 : i32
    %c0_i32_2 = arith.constant 0 : i32
    return %c0_i32, %c0_i32_0, %c0_i32_1 : i32, i32, i32
  }
  func.func @transform_4(%arg0: i32) -> (i32, i32, i32) {
    %c0_i32 = arith.constant 0 : i32
    %c0_i32_0 = arith.constant 0 : i32
    %c0_i32_1 = arith.constant 0 : i32
    %c0_i32_2 = arith.constant 0 : i32
    return %c0_i32, %c0_i32_0, %c0_i32_1 : i32, i32, i32
  }
  func.func @transform_5(%arg0: i32) -> (i32, i32) {
    %c0_i32 = arith.constant 0 : i32
    %c0_i32_0 = arith.constant 0 : i32
    %c0_i32_1 = arith.constant 0 : i32
    return %c0_i32, %c0_i32_0 : i32, i32
  }
  func.func @transform_6(%arg0: i32) -> (i32, i32) {
    %c0_i32 = arith.constant 0 : i32
    %c0_i32_0 = arith.constant 0 : i32
    %c0_i32_1 = arith.constant 0 : i32
    return %c0_i32, %c0_i32_0 : i32, i32
  }
  func.func @transform_7(%arg0: i32) -> (i32, i32) {
    %c0_i32 = arith.constant 0 : i32
    %c0_i32_0 = arith.constant 0 : i32
    %c0_i32_1 = arith.constant 0 : i32
    return %c0_i32, %c0_i32_0 : i32, i32
  }
  func.func @transform_8(%arg0: i32) -> (i32, i32) {
    %c0_i32 = arith.constant 0 : i32
    %c0_i32_0 = arith.constant 0 : i32
    %c0_i32_1 = arith.constant 0 : i32
    return %c0_i32, %c0_i32_0 : i32, i32
  }
  func.func @transform_9(%arg0: i32) -> (i32, i32, i32) {
    %c0_i32 = arith.constant 0 : i32
    %c0_i32_0 = arith.constant 0 : i32
    %c0_i32_1 = arith.constant 0 : i32
    return %arg0, %c0_i32, %c0_i32_0 : i32, i32, i32
  }
}

</mosaic_0001>

<bundles_post_ra>
// kernel: tcn_autoencoder_forward.1
= control target key start
LH: loop header
LB: loop body
LE: loop exit
PB: predicated region body
PF: predicated region fallthrough
CT: control target
= control target key end

     0   :  { %14 = vsyncpa [#allocation4], 0  ;;  %s3949_s0 = inlined_call_operand.vmem [shape: f32[2,16,128], index: 0, kind: input, shape index: {}]   ;;  %s3950_s1 = inlined_call_operand.hbm [shape: bf16[3,384,128], index: 1, kind: input, shape index: {}]   ;;  %s3951_s2 = inlined_call_operand.vmem [shape: f32[3,1,128], index: 2, kind: input, shape index: {}]   ;;  %s3952_s3 = inlined_call_operand.hbm [shape: bf16[3,384,128], index: 3, kind: input, shape index: {}]   ;;  %s3953_s4 = inlined_call_operand.vmem [shape: f32[3,1,128], index: 4, kind: input, shape index: {}]   ;;  %s3954_s5 = inlined_call_operand.vmem [shape: bf16[128,128], index: 5, kind: input, shape index: {}]   ;;  %s3955_s6 = inlined_call_operand.vmem [shape: f32[1,128], index: 6, kind: input, shape index: {}]   ;;  %s3956_s7 = inlined_call_operand.hbm [shape: bf16[384,128], index: 7, kind: input, shape index: {}]   ;;  %s3957_s8 = inlined_call_operand.vmem [shape: f32[1,128], index: 8, kind: input, shape index: {}]   ;;  %s3958_s9 = inlined_call_operand.vmem [shape: f32[2,16,128], index: 9, kind: output, shape index: {}]  }
   0x1   :  { %15 = vsyncpa [#allocation6], 0  ;;  %s3795_s30 = smov 0  }
   0x2 LB: > { %s3801_s10 = sadd.s32 4294967295, %s3737_s30   ;;  %p2586_p0 = scmp.ge.s32.totalorder %s3737_s30, 1  ;;  %s3737_s30 = sphi %s3795_s30, %s21_s30  }
   0x3   : > { %p246_p1 = scmp.lt.s32.totalorder %s3737_s30, 3  ;;  %p3605_p2 = scmp.eq.s32.totalorder %s3801_s10, 0 }
   0x4   : > { %s274_s13 = sshll.u32 %s3952_s3, 4  ;;  %s257_s17 = sshll.u32 %s3950_s1, 4  ;;  %s275_s13 = int_to_ptr.hbm [resolvable:$true] %s274_s13  ;;  %s258_s17 = int_to_ptr.hbm [resolvable:$true] %s257_s17 }
   0x5   : > { %p3809_p3 = pnand %p2586_p0, %p246_p1  ;;  %s3739_s18 = smov [#allocation5]  }
   0x6   : > { %s276_s19 = sshll.u32 %s3739_s18, 4  ;;  %s3740_s20 = smov [#allocation3]   ;;  %s277_s19 = int_to_ptr.vmem [resolvable:$true] %s276_s19 }
   0x7   : > { %p3595_p4 = pneg %p3809_p3  ;;  %s259_s21 = sshll.u32 %s3740_s20, 4  ;;  %s260_s21 = int_to_ptr.vmem [resolvable:$true] %s259_s21 }
   0x8   : > { %s297_s24 = sshll.u32 %s3956_s7, 4  ;;  %s3741_s25 = smov 64   ;;  %s298_s24 = int_to_ptr.hbm [resolvable:$true] %s297_s24 }
   0x9   : > { %p3596_p5 = pnand %p3605_p2, %p3595_p4  ;;  %s3742_s26 = smov 4  }
   0xa   : > { %s3743_s27 = smov [#allocation7]   ;;  %326 = sbr.rel (%p3809_p3) target bundleno = 1189 (0x4a5), region = 56 }
   0xb   : > { %3601 = dma.hbm_to_vmem [thread:$0]  (!%p3596_p5), %s275_s13, 9216, %s277_s19, [#allocation6], %s3741_s25, %s3741_s25, %s3742_s26  }
   0xc   : > { %3598 = dma.hbm_to_vmem [thread:$0]  (!%p3596_p5), %s258_s17, 9216, %s260_s21, [#allocation4], %s3741_s25, %s3741_s25, %s3742_s26  }
   0xd   : > { %s299_s28 = sshll.u32 %s3743_s27, 4  ;;  %s300_s28 = int_to_ptr.vmem [resolvable:$true] %s299_s28 }
   0xe   : > { %3604 = dma.hbm_to_vmem [thread:$0]  (!%p3596_p5), %s298_s24, 3072, %s300_s28, [#allocation6], %s3741_s25, %s3741_s25, %s3742_s26  }
   0xf   : > { %3728 = dma.done.wait (%p3605_p2), [#allocation4], 9216  }
  0x10   : > { %3730 = vsyncadd (%p3605_p2), [#allocation4], 4294958080 }
  0x11   : > { %3732 = dma.done.wait (%p3605_p2), [#allocation6], 12288  }
  0x12   : > { %3734 = vsyncadd (%p3605_p2), [#allocation6], 4294955008  ;;  %p373_p6 = scmp.lt.s32.totalorder %s3801_s10, 1  ;;  %v3744_v0 = vmov 0   ;;  %v3330_v1 = vld [vmem:[#allocation3 + $0x38] sm:$0xff]  ;;  %v3329_v4 = vld [vmem:[#allocation3 + $0x30] sm:$0xff] }
  0x13   : > { %385 = vst [vmem:[#allocation2 + $0x4] sm:$0xf] %v3744_v0  ;;  %v3338_v2 = vld [vmem:[#allocation3 + $0x78] sm:$0xff]  ;;  %724 = vmatpush.bf16.msra.mxu1 %v3330_v1  ;;  %v3337_v5 = vld [vmem:[#allocation3 + $0x70] sm:$0xff]  ;;  %v3328_v7 = vld [vmem:[#allocation3 + $0x28] sm:$0xff]  ;;  %vm568_vm1 = vcmask 1044480  }
  0x14   : > { %386 = vst [vmem:[#allocation2 + $0x8] sm:$0xf] %v3744_v0  ;;  %s3961_s10 = smov (!%p373_p6, %s3801_s10), 1  ;;  %v3346_v3 = vld [vmem:[#allocation3 + $0xb8] sm:$0xff]  ;;  %738 = vmatpush.bf16.msra.mxu2 %v3338_v2  ;;  %v3345_v6 = vld [vmem:[#allocation3 + $0xb0] sm:$0xff]  ;;  %v3336_v8 = vld [vmem:[#allocation3 + $0x68] sm:$0xff] }
  0x15   : > { %387 = vst [vmem:[#allocation2 + $0xc] sm:$0xf] %v3744_v0  ;;  %s3313_s29 = sshll.u32 %s3961_s10, 4  ;;  %752 = vmatpush.bf16.msra.mxu3 %v3346_v3  ;;  %v3344_v9 = vld [vmem:[#allocation3 + $0xa8] sm:$0xff]  ;;  %v3327_v14 = vld [vmem:[#allocation3 + $0x20] sm:$0xff]  ;;  %v3326_v20 = vld [vmem:[#allocation3 + $0x18] sm:$0xff] }
  0x16   : > { %s377_s13 = scalar_lea.vmem %s3949_s0, %s3313_s29  ;;  %v3322_v13 = vld [vmem:[%s3954_s5 + $0x38] sm:$0xff]  ;;  %v3321_v18 = vld [vmem:[%s3954_s5 + $0x30] sm:$0xff]  ;;  %v3320_v24 = vld [vmem:[%s3954_s5 + $0x28] sm:$0xff]  ;;  %vm548_vm0 = vsmask.f32 7424  ;;  %vm1145_vm2 = vcmask 1045504   ;;  %s382_s12 = scalar_lea.vmem %s3958_s9, %s3313_s29 }
  0x17   : > { %725 = vmatpush.bf16.msra.mxu1 %v3329_v4  ;;  %v394_v10 = vld [vmem:[%s377_s13] sm:$0xff]  ;;  %v395_v11 = vld [vmem:[%s377_s13 + $0x8] sm:$0xff]  ;;  %v3335_v15 = vld [vmem:[#allocation3 + $0x60] sm:$0xff]  ;;  %476 = vmatpush.bf16.msra.mxu0 %v3322_v13  ;;  %vm1134_vm3 = vcmask 1046528   ;;  %vm388_vm4 = vcmask 1040384   ;;  %vm2256_vm7 = vcmask 1042432  }
  0x18   : > { %739 = vmatpush.bf16.msra.mxu2 %v3337_v5  ;;  %v3843_v12 = vpack.c.bf16 %v395_v11, %v394_v10  ;;  %v3343_v16 = vld [vmem:[#allocation3 + $0xa0] sm:$0xff]  ;;  %v3334_v21 = vld [vmem:[#allocation3 + $0x58] sm:$0xff]  ;;  %v3325_v26 = vld [vmem:[#allocation3 + $0x10] sm:$0xff]  ;;  %vm389_vm5 = vsmask.f32 256 }
  0x19   : > { %753 = vmatpush.bf16.msra.mxu3 %v3345_v6  ;;  %v3342_v22 = vld [vmem:[#allocation3 + $0x98] sm:$0xff]  ;;  %v3333_v27 = vld [vmem:[#allocation3 + $0x50] sm:$0xff]  ;;  %v3324_v38 = vld [vmem:[#allocation3 + $0x8] sm:$0xff]  ;;  %vm2263_vm8 = vsmask.f32 4352 }
  0x1a   : > { %3554 = vst [vmem:[#allocation2 + $0x8] sm:$0xff] %v3843_v12   ;;  %v3499_v17 = vunpack.c.h.b16 %v3843_v12  ;;  %v3558_v25 = vld [vmem:[#allocation2 + $0x4] sm:$0x8]  ;;  %v3332_v39 = vld [vmem:[#allocation3 + $0x48] sm:$0xff]  ;;  %v3323_v46 = vld [vmem:[#allocation3] sm:$0xff] }
  0x1b   : > { %726 = vmatpush.bf16.msra.mxu1 %v3328_v7  ;;  %477 = vmatpush.bf16.msra.mxu0 %v3321_v18  ;;  %v3341_v32 = vld [vmem:[#allocation3 + $0x90] sm:$0xff]  ;;  %v3340_v42 = vld [vmem:[#allocation3 + $0x88] sm:$0xff]  ;;  %v3331_v47 = vld [vmem:[#allocation3 + $0x40] sm:$0xff] }
  0x1c   : > { %740 = vmatpush.bf16.msra.mxu2 %v3336_v8  ;;  %v547_v19 = vpack.c.b16 %v3499_v17, %v3499_v17  ;;  %v3319_v35 = vld [vmem:[%s3954_s5 + $0x20] sm:$0xff]  ;;  %v3318_v44 = vld [vmem:[%s3954_s5 + $0x18] sm:$0xff]  ;;  %v3317_v53 = vld [vmem:[%s3954_s5 + $0x10] sm:$0xff] }
  0x1d   : > { %754 = vmatpush.bf16.msra.mxu3 %v3344_v9  ;;  %v3339_v51 = vld [vmem:[#allocation3 + $0x80] sm:$0xff]  ;;  %v3370_v57 = vld [vmem:[#allocation5 + $0xb8] sm:$0xff]  ;;  %v3369_v58 = vld [vmem:[#allocation5 + $0xb0] sm:$0xff] }
  0x1e   : > { %v557_v23 = vshll.u32 %v547_v19, 16  ;;  %v561_v31 = vshrl.u32 %v547_v19, 16  ;;  %v3368_v59 = vld [vmem:[#allocation5 + $0xa8] sm:$0xff]  ;;  %v3316_v60 = vld [vmem:[%s3954_s5 + $0x8] sm:$0xff]  ;;  %v3367_v62 = vld [vmem:[#allocation5 + $0xa0] sm:$0xff] }
  0x1f   : > { %727 = vmatpush.bf16.msra.mxu1 %v3327_v14  ;;  %478 = vmatpush.bf16.msra.mxu0 %v3320_v24  ;;  %v3315_v61 = vld [vmem:[%s3954_s5] sm:$0xff]  ;;  %v3354_v63 = vld [vmem:[#allocation5 + $0x38] sm:$0xff]  ;;  %v3351_v7 = vld [vmem:[#allocation5 + $0x20] sm:$0xff] }
  0x20   : > { %741 = vmatpush.bf16.msra.mxu2 %v3335_v15  ;;  %v559_v30 = vrot.slane %v557_v23, 1  ;;  %v3366_v0 = vld [vmem:[#allocation5 + $0x98] sm:$0xff]  ;;  %v3353_v1 = vld [vmem:[#allocation5 + $0x30] sm:$0xff]  ;;  %v3352_v4 = vld [vmem:[#allocation5 + $0x28] sm:$0xff] }
  0x21   : > { %755 = vmatpush.bf16.msra.mxu3 %v3343_v16  ;;  %v3572_v28 = vld [vmem:[#allocation2 + $0x4] sm:$0xf0]   ;;  %v540_v29 = vld [vmem:[#allocation2 + $0xc] sm:$0x7]  ;;  %v3364_v6 = vld [vmem:[#allocation5 + $0x88] sm:$0xff] }
  0x22   : > { %v544_v33 = vunpack.c.l.b16 %v540_v29  ;;  %v3559_v34 = vor.u32 %v3572_v28, %v3558_v25  ;;  %v563_v41 = vor.u32 %v561_v31, %v559_v30  ;;  %v3362_v2 = vld [vmem:[#allocation5 + $0x78] sm:$0xff]  ;;  %v3365_v3 = vld [vmem:[#allocation5 + $0x90] sm:$0xff]  ;;  %v3360_v8 = vld [vmem:[#allocation5 + $0x68] sm:$0xff] }
  0x23   : > { %728 = vmatpush.bf16.msra.mxu1 %v3326_v20  ;;  %479 = vmatpush.bf16.msra.mxu0 %v3319_v35  ;;  %v3361_v5 = vld [vmem:[#allocation5 + $0x70] sm:$0xff]  ;;  %v3363_v9 = vld [vmem:[#allocation5 + $0x80] sm:$0xff]  ;;  %v3350_v10 = vld [vmem:[#allocation5 + $0x18] sm:$0xff] }
  0x24   : > { %742 = vmatpush.bf16.msra.mxu2 %v3334_v21  ;;  %v550_v36 = vshrl.u32 %v3559_v34, 16  ;;  %v552_v37 = vshll.u32 %v3559_v34, 16  ;;  %v546_v40 = vpack.c.b16 %v544_v33, %v544_v33  ;;  %v569_v48 = vrot.slane %v3559_v34, 3  ;;  %v3359_v11 = vld [vmem:[#allocation5 + $0x60] sm:$0xff]  ;;  %v3358_v13 = vld [vmem:[#allocation5 + $0x58] sm:$0xff]  ;;  %v3348_v14 = vld [vmem:[#allocation5 + $0x8] sm:$0xff] }
  0x25   : > { %756 = vmatpush.bf16.msra.mxu3 %v3342_v22  ;;  %v573_v50 = vrot.slane %v563_v41, 3  ;;  %v3357_v15 = vld [vmem:[#allocation5 + $0x50] sm:$0xff]  ;;  %v3347_v17 = vld [vmem:[#allocation5] sm:$0xff]  ;;  %v3356_v18 = vld [vmem:[#allocation5 + $0x48] sm:$0xff] }
  0x26   : > { %v554_v43 = vrot.slane %v552_v37, 1  ;;  %v570_v49 = vrot.slane %v546_v40, 3  ;;  %v3625_v19 = vld [vmem:[%s3951_s2] ss:$0 sm:$0xff]  ;;  %v3355_v21 = vld [vmem:[#allocation5 + $0x40] sm:$0xff]  ;;  %vm390_vm6 = vmand %vm388_vm4, %vm389_vm5 }
  0x27   : > { %729 = vmatpush.bf16.msra.mxu1 %v3325_v26  ;;  %480 = vmatpush.bf16.msra.mxu0 %v3318_v44 }
  0x28   : > { %743 = vmatpush.bf16.msra.mxu2 %v3333_v27  ;;  %v555_v45 = vor.u32 %v554_v43, %v550_v36  ;;  %v571_v55 = vsel %vm568_vm1, %v569_v48, %v570_v49 }
  0x29   : > { %757 = vmatpush.bf16.msra.mxu3 %v3341_v32 }
  0x2a   : > { %v560_v52 = vsel %vm548_vm0, %v555_v45, %v559_v30 }
  0x2b   : > { %730 = vmatpush.bf16.msra.mxu1 %v3324_v38  ;;  %v572_v54 = vrot.slane %v560_v52, 3  ;;  %481 = vmatpush.bf16.msra.mxu0 %v3317_v53  ;;  %v3575_v38 = vld [vmem:[#allocation2 + $0x4] sm:$0x8] }
  0x2c   : > { %744 = vmatpush.bf16.msra.mxu2 %v3332_v39 }
  0x2d   : > { %758 = vmatpush.bf16.msra.mxu3 %v3340_v42  ;;  %v574_v56 = vsel %vm568_vm1, %v572_v54, %v573_v50 }
  0x2f   : > { %731 = vmatpush.bf16.msra.mxu1 %v3323_v46  ;;  %482 = vmatpush.bf16.msra.mxu0 %v3316_v60  ;;  %v3392_v60 = vld [vmem:[#allocation3 + $0x168] sm:$0xff] }
  0x30   : > { %745 = vmatpush.bf16.msra.mxu2 %v3331_v47 }
  0x31   : > { %759 = vmatpush.bf16.msra.mxu3 %v3339_v51 }
  0x32   : > { %732 = vmatmul.bf16.vlgmr.msra.gmra.mxu1 %v571_v55 }
  0x33   : > { %746 = vmatmul.bf16.vlgmr.msra.gmra.mxu2 %v574_v56  ;;  %483 = vmatpush.bf16.msra.mxu0 %v3315_v61  ;;  %v3391_v61 = vld [vmem:[#allocation3 + $0x160] sm:$0xff] }
  0x34   : > { %760 = vmatmul.bf16.vlgmr.msra.gmra.mxu3 %v3843_v12  ;;  %1039 = vmatpush.bf16.msrb.mxu2 %v3370_v57 }
  0x35   : > { %1025 = vmatpush.bf16.msrb.mxu1 %v3362_v2 }
  0x36   : > { %484 = vmatmul.bf16.vlgmr.msra.gmra.mxu0 %v3843_v12  ;;  %v3349_v12 = vld [vmem:[#allocation5 + $0x10] sm:$0xff] }
  0x37   : > { %1011 = vmatpush.bf16.msrb.mxu0 %v3354_v63  ;;  %v3390_v63 = vld [vmem:[#allocation3 + $0x158] sm:$0xff] }
  0x38   : > { %1040 = vmatpush.bf16.msrb.mxu2 %v3369_v58  ;;  %v3394_v58 = vld [vmem:[#allocation3 + $0x178] sm:$0xff] }
  0x39   : > { %1026 = vmatpush.bf16.msrb.mxu1 %v3361_v5  ;;  %v3376_v5 = vld [vmem:[#allocation3 + $0xe8] sm:$0xff] }
  0x3b   : > { %1012 = vmatpush.bf16.msrb.mxu0 %v3353_v1  ;;  %v3377_v1 = vld [vmem:[#allocation3 + $0xf0] sm:$0xff] }
  0x3c   : > { %1041 = vmatpush.bf16.msrb.mxu2 %v3368_v59  ;;  %v3393_v59 = vld [vmem:[#allocation3 + $0x170] sm:$0xff] }
  0x3d   : > { %1027 = vmatpush.bf16.msrb.mxu1 %v3360_v8  ;;  %v3375_v8 = vld [vmem:[#allocation3 + $0xe0] sm:$0xff] }
  0x3f   : > { %1013 = vmatpush.bf16.msrb.mxu0 %v3352_v4  ;;  %v3385_v4 = vld [vmem:[#allocation3 + $0x130] sm:$0xff] }
  0x40   : > { %1042 = vmatpush.bf16.msrb.mxu2 %v3367_v62  ;;  %v3378_v62 = vld [vmem:[#allocation3 + $0xf8] sm:$0xff] }
  0x41   : > { %1028 = vmatpush.bf16.msrb.mxu1 %v3359_v11  ;;  %1301 = vmatpush.bf16.msrb.mxu3 %v3378_v62  ;;  %v3383_v11 = vld [vmem:[#allocation3 + $0x120] sm:$0xff] }
  0x43   : > { %1014 = vmatpush.bf16.msrb.mxu0 %v3351_v7  ;;  %v3384_v7 = vld [vmem:[#allocation3 + $0x128] sm:$0xff] }
  0x44   : > { %1043 = vmatpush.bf16.msrb.mxu2 %v3366_v0  ;;  %v3386_v0 = vld [vmem:[#allocation3 + $0x138] sm:$0xff] }
  0x45   : > { %1029 = vmatpush.bf16.msrb.mxu1 %v3358_v13  ;;  %1302 = vmatpush.bf16.msrb.mxu3 %v3377_v1  ;;  %v3382_v13 = vld [vmem:[#allocation3 + $0x118] sm:$0xff] }
  0x46   : > { %v3418_v1 = vld [vmem:[#allocation5 + $0x178] sm:$0xff] }
  0x47   : > { %1015 = vmatpush.bf16.msrb.mxu0 %v3350_v10 }
  0x48   : > { %1044 = vmatpush.bf16.msrb.mxu2 %v3365_v3  ;;  %v3389_v3 = vld [vmem:[#allocation3 + $0x150] sm:$0xff] }
  0x49   : > { %1030 = vmatpush.bf16.msrb.mxu1 %v3357_v15  ;;  %1303 = vmatpush.bf16.msrb.mxu3 %v3376_v5  ;;  %v3381_v15 = vld [vmem:[#allocation3 + $0x110] sm:$0xff]  ;;  %v3402_v5 = vld [vmem:[#allocation5 + $0xf8] sm:$0xff] }
  0x4b   : > { %1016 = vmatpush.bf16.msrb.mxu0 %v3349_v12  ;;  %v3374_v12 = vld [vmem:[#allocation3 + $0xd8] sm:$0xff] }
  0x4c   : > { %1045 = vmatpush.bf16.msrb.mxu2 %v3364_v6  ;;  %v3388_v6 = vld [vmem:[#allocation3 + $0x148] sm:$0xff] }
  0x4d   : > { %1031 = vmatpush.bf16.msrb.mxu1 %v3356_v18  ;;  %1304 = vmatpush.bf16.msrb.mxu3 %v3375_v8  ;;  %v3401_v8 = vld [vmem:[#allocation5 + $0xf0] sm:$0xff] }
  0x4f   : > { %1017 = vmatpush.bf16.msrb.mxu0 %v3348_v14  ;;  %v3373_v14 = vld [vmem:[#allocation3 + $0xd0] sm:$0xff] }
  0x50   : > { %1046 = vmatpush.bf16.msrb.mxu2 %v3363_v9  ;;  %v3387_v9 = vld [vmem:[#allocation3 + $0x140] sm:$0xff] }
  0x51   : > { %1032 = vmatpush.bf16.msrb.mxu1 %v3355_v21  ;;  %1305 = vmatpush.bf16.msrb.mxu3 %v3374_v12  ;;  %v3412_v12 = vld [vmem:[#allocation5 + $0x148] sm:$0xff] }
  0x53   : > { %1018 = vmatpush.bf16.msrb.mxu0 %v3347_v17  ;;  %v3627_v17 = vld [vmem:[%s3953_s4] ss:$0 sm:$0xff] }
  0x54   : > { %1585 = vmatpush.bf16.msra.mxu2 %v3402_v5  ;;  %v3441_v5 = vld [vmem:[#allocation3 + $0x230] sm:$0xff] }
  0x55   : > { %1329 = vmatpush.bf16.msra.mxu1 %v3394_v58  ;;  %1306 = vmatpush.bf16.msrb.mxu3 %v3373_v14  ;;  %v3399_v14 = vld [vmem:[#allocation5 + $0xe0] sm:$0xff] }
  0x57   : > { %1315 = vmatpush.bf16.msra.mxu0 %v3386_v0 }
  0x58   : > { %1586 = vmatpush.bf16.msra.mxu2 %v3401_v8  ;;  %v3424_v8 = vld [vmem:[#allocation3 + $0x1a8] sm:$0xff] }
  0x59   : > { %1330 = vmatpush.bf16.msra.mxu1 %v3393_v59 }
  0x5b   : > { %1316 = vmatpush.bf16.msra.mxu0 %v3385_v4  ;;  %v3415_v4 = vld [vmem:[#allocation5 + $0x160] sm:$0xff] }
  0x5d   : > { %1331 = vmatpush.bf16.msra.mxu1 %v3392_v60 }
  0x5f   : > { %1317 = vmatpush.bf16.msra.mxu0 %v3384_v7  ;;  %v3410_v7 = vld [vmem:[#allocation5 + $0x138] sm:$0xff] }
  0x61   : > { %1332 = vmatpush.bf16.msra.mxu1 %v3391_v61 }
  0x63   : > { %1318 = vmatpush.bf16.msra.mxu0 %v3383_v11  ;;  %v3400_v11 = vld [vmem:[#allocation5 + $0xe8] sm:$0xff] }
  0x64   : > { %1587 = vmatpush.bf16.msra.mxu2 %v3400_v11  ;;  %v3423_v11 = vld [vmem:[#allocation3 + $0x1a0] sm:$0xff] }
  0x65   : > { %1333 = vmatpush.bf16.msra.mxu1 %v3390_v63 }
  0x67   : > { %1319 = vmatpush.bf16.msra.mxu0 %v3382_v13  ;;  %v3408_v13 = vld [vmem:[#allocation5 + $0x128] sm:$0xff] }
  0x68   : > { %1588 = vmatpush.bf16.msra.mxu2 %v3399_v14  ;;  %v3422_v14 = vld [vmem:[#allocation3 + $0x198] sm:$0xff] }
  0x69   : > { %1334 = vmatpush.bf16.msra.mxu1 %v3389_v3  ;;  %v3416_v3 = vld [vmem:[#allocation5 + $0x168] sm:$0xff] }
  0x6b   : > { %1320 = vmatpush.bf16.msra.mxu0 %v3381_v15  ;;  %v3411_v15 = vld [vmem:[#allocation5 + $0x140] sm:$0xff] }
  0x6d   : > { %1335 = vmatpush.bf16.msra.mxu1 %v3388_v6  ;;  %v3414_v6 = vld [vmem:[#allocation5 + $0x158] sm:$0xff] }
  0x71   : > { %1336 = vmatpush.bf16.msra.mxu1 %v3387_v9  ;;  %v3413_v9 = vld [vmem:[#allocation5 + $0x150] sm:$0xff] }
  0xaf   : > { %v733_v16 = vpop.f32.mrf.mxu1 }
  0xb0   : > { %v734_v22 = vadd.f32 %v3625_v19, %v733_v16  ;;  %v3372_v16 = vld [vmem:[#allocation3 + $0xc8] sm:$0xff] }
  0xb1   : > { %1307 = vmatpush.bf16.msrb.mxu3 %v3372_v16  ;;  %v3407_v16 = vld [vmem:[#allocation5 + $0x120] sm:$0xff] }
  0xb3   : > { %v485_v2 = vpop.f32.mrf.mxu0 }
  0xb6   : > { %v747_v20 = vpop.f32.mrf.mxu2 }
  0xb7   : > { %v761_v23 = vpop.f32.mrf.mxu3  ;;  %v735_v24 = vpop.f32.mrf.mxu1  ;;  %v748_v25 = vadd.f32 %v747_v20, %v734_v22  ;;  %v3371_v20 = vld [vmem:[#allocation3 + $0xc0] sm:$0xff] }
  0xb8   : > { %v736_v26 = vadd.f32 %v3625_v19, %v735_v24  ;;  %v3380_v19 = vld [vmem:[#allocation3 + $0x108] sm:$0xff]  ;;  %1308 = vmatpush.bf16.msrb.mxu3 %v3371_v20  ;;  %v3405_v20 = vld [vmem:[#allocation5 + $0x110] sm:$0xff] }
  0xb9   : > { %v762_v28 = vadd.f32 %v761_v23, %v748_v25  ;;  %1321 = vmatpush.bf16.msra.mxu0 %v3380_v19  ;;  %v3379_v25 = vld [vmem:[#allocation3 + $0x100] sm:$0xff]  ;;  %v3397_v19 = vld [vmem:[#allocation5 + $0xd0] sm:$0xff] }
  0xbb   : > { %v766_v32 = vmax.f32 %v762_v28, 0.0  ;;  %v487_v10 = vpop.f32.mrf.mxu0  ;;  %v3626_v28 = vld [vmem:[%s3955_s6] ss:$0 sm:$0xff] }
  0xbc   : > { %1599 = vmatpush.bf16.msra.mxu3 %v3410_v7  ;;  %v3440_v7 = vld [vmem:[#allocation3 + $0x228] sm:$0xff] }
  0xbd   : > { %1322 = vmatpush.bf16.msra.mxu0 %v3379_v25 }
  0xbe   : > { %v749_v27 = vpop.f32.mrf.mxu2 }
  0xbf   : > { %v750_v29 = vadd.f32 %v749_v27, %v736_v26  ;;  %v763_v30 = vpop.f32.mrf.mxu3 }
  0xc1   : > { %v764_v31 = vadd.f32 %v763_v30, %v750_v29 }
  0xc3   : > { %v767_v33 = vmax.f32 %v764_v31, 0.0 }
  0xc5   : > { %v3503_v34 = vpack.c.bf16 %v767_v33, %v766_v32 }
  0xc7   : > { %3560 = vst [vmem:[#allocation2 + $0x8] sm:$0xff] %v3503_v34   ;;  %v3508_v35 = vunpack.c.h.b16 %v3503_v34  ;;  %1047 = vmatmul.bf16.vlgmr.msrb.gmra.mxu2 %v3503_v34  ;;  %v486_v34 = vadd.f32 %v3626_v28, %v485_v2  ;;  %v3417_v2 = vld [vmem:[#allocation5 + $0x170] sm:$0xff] }
  0xc9   : > { %v835_v36 = vpack.c.b16 %v3508_v35, %v3508_v35 }
  0xcb   : > { %v844_v37 = vshll.u32 %v835_v36, 16  ;;  %v848_v46 = vshrl.u32 %v835_v36, 16  ;;  %v488_v36 = vadd.f32 %v3626_v28, %v487_v10  ;;  %v3409_v10 = vld [vmem:[#allocation5 + $0x130] sm:$0xff] }
  0xcc   : > { %1600 = vmatpush.bf16.msra.mxu3 %v3409_v10  ;;  %v3434_v10 = vld [vmem:[#allocation3 + $0x1f8] sm:$0xff] }
  0xcd   : > { %v846_v43 = vrot.slane %v844_v37, 1 }
  0xce   : > { %v3581_v39 = vld [vmem:[#allocation2 + $0x4] sm:$0xf0]   ;;  %v823_v40 = vld [vmem:[#allocation2 + $0xc] sm:$0x7] }
  0xcf   : > { %v830_v41 = vunpack.c.l.b16 %v823_v40  ;;  %v3576_v42 = vor.u32 %v3581_v39, %v3575_v38  ;;  %v850_v51 = vor.u32 %v848_v46, %v846_v43 }
  0xd0   : > { %1601 = vmatpush.bf16.msra.mxu3 %v3408_v13  ;;  %v3433_v13 = vld [vmem:[#allocation3 + $0x1f0] sm:$0xff] }
  0xd1   : > { %v832_v44 = vpack.c.b16 %v830_v41, %v830_v41  ;;  %v839_v45 = vshll.u32 %v3576_v42, 16  ;;  %v856_v47 = vrot.slane %v3576_v42, 3  ;;  %v837_v49 = vshrl.u32 %v3576_v42, 16 }
  0xd2   : > { %v860_v56 = vrot.slane %v850_v51, 3 }
  0xd3   : > { %v857_v48 = vrot.slane %v832_v44, 3  ;;  %v841_v50 = vrot.slane %v839_v45, 1  ;;  %v1114_v44 = vld [vmem:[#allocation2 + $0x4] sm:$0xc] }
  0xd4   : > { %1602 = vmatpush.bf16.msra.mxu3 %v3407_v16  ;;  %v3432_v16 = vld [vmem:[#allocation3 + $0x1e8] sm:$0xff] }
  0xd5   : > { %v858_v52 = vsel %vm568_vm1, %v856_v47, %v857_v48  ;;  %v842_v53 = vor.u32 %v841_v50, %v837_v49  ;;  %v1123_v47 = vunpack.c.l.b16 %v1114_v44 }
  0xd6   : > { %1019 = vmatmul.bf16.vlgmr.msrb.gmra.mxu0 %v858_v52 }
  0xd7   : > { %v847_v54 = vsel %vm548_vm0, %v842_v53, %v846_v43  ;;  %v1117_v43 = vld [vmem:[#allocation2 + $0x4] sm:$0x8]  ;;  %1613 = vmatpush.bf16.msrb.mxu0 %v3418_v1 }
  0xd8   : > { %v859_v55 = vrot.slane %v847_v54, 3  ;;  %v1130_v46 = vunpack.c.l.b16 %v1117_v43 }
  0xda   : > { %v861_v57 = vsel %vm568_vm1, %v859_v55, %v860_v56 }
  0xdb   : > { %1033 = vmatmul.bf16.vlgmr.msrb.gmra.mxu1 %v861_v57  ;;  %1614 = vmatpush.bf16.msrb.mxu0 %v3417_v2 }
  0xdf   : > { %1615 = vmatpush.bf16.msrb.mxu0 %v3416_v3  ;;  %v3442_v3 = vld [vmem:[#allocation3 + $0x238] sm:$0xff] }
  0xe3   : > { %1616 = vmatpush.bf16.msrb.mxu0 %v3415_v4  ;;  %v3426_v4 = vld [vmem:[#allocation3 + $0x1b8] sm:$0xff] }
  0xe4   : > { %1860 = vmatpush.bf16.msrb.mxu1 %v3426_v4  ;;  %v3447_v4 = vld [vmem:[#allocation5 + $0x1a0] sm:$0xff] }
  0xe7   : > { %1617 = vmatpush.bf16.msrb.mxu0 %v3414_v6  ;;  %v3425_v6 = vld [vmem:[#allocation3 + $0x1b0] sm:$0xff] }
  0xe8   : > { %1861 = vmatpush.bf16.msrb.mxu1 %v3425_v6  ;;  %v3457_v6 = vld [vmem:[#allocation5 + $0x1f0] sm:$0xff] }
  0xeb   : > { %1618 = vmatpush.bf16.msrb.mxu0 %v3413_v9  ;;  %v3439_v9 = vld [vmem:[#allocation3 + $0x220] sm:$0xff] }
  0xec   : > { %1862 = vmatpush.bf16.msrb.mxu1 %v3424_v8  ;;  %v3461_v8 = vld [vmem:[#allocation5 + $0x210] sm:$0xff] }
  0xef   : > { %1619 = vmatpush.bf16.msrb.mxu0 %v3412_v12  ;;  %v3438_v12 = vld [vmem:[#allocation3 + $0x218] sm:$0xff] }
  0xf0   : > { %1863 = vmatpush.bf16.msrb.mxu1 %v3423_v11  ;;  %v3460_v11 = vld [vmem:[#allocation5 + $0x208] sm:$0xff] }
  0xf3   : > { %1620 = vmatpush.bf16.msrb.mxu0 %v3411_v15  ;;  %v3437_v15 = vld [vmem:[#allocation3 + $0x210] sm:$0xff] }
  0xf4   : > { %1864 = vmatpush.bf16.msrb.mxu1 %v3422_v14  ;;  %v3459_v14 = vld [vmem:[#allocation5 + $0x200] sm:$0xff] }
 0x14a   : > { %v1048_v22 = vpop.f32.mrf.mxu2 }
 0x152   : > { %v1050_v33 = vpop.f32.mrf.mxu2 }
 0x153   : > { %v1020_v18 = vpop.f32.mrf.mxu0 }
 0x154   : > { %v1021_v21 = vadd.f32 %v3627_v17, %v1020_v18  ;;  %v3406_v18 = vld [vmem:[#allocation5 + $0x118] sm:$0xff] }
 0x155   : > { %1603 = vmatpush.bf16.msra.mxu3 %v3406_v18  ;;  %v3436_v18 = vld [vmem:[#allocation3 + $0x208] sm:$0xff] }
 0x158   : > { %v1034_v23 = vpop.f32.mrf.mxu1 }
 0x159   : > { %v1035_v24 = vadd.f32 %v1034_v23, %v1021_v21  ;;  %v3396_v21 = vld [vmem:[#allocation5 + $0xc8] sm:$0xff]  ;;  %1604 = vmatpush.bf16.msra.mxu3 %v3405_v20  ;;  %v3395_v23 = vld [vmem:[#allocation5 + $0xc0] sm:$0xff] }
 0x15a   : > { %v3420_v20 = vld [vmem:[#allocation3 + $0x188] sm:$0xff] }
 0x15b   : > { %v1022_v26 = vpop.f32.mrf.mxu0  ;;  %v1049_v27 = vadd.f32 %v1048_v22, %v1035_v24  ;;  %v3404_v22 = vld [vmem:[#allocation5 + $0x108] sm:$0xff] }
 0x15c   : > { %v1023_v29 = vadd.f32 %v3627_v17, %v1022_v26  ;;  %v3398_v17 = vld [vmem:[#allocation5 + $0xd8] sm:$0xff]  ;;  %v3628_v24 = vld [vmem:[%s3951_s2 + $0x1] ss:$0 sm:$0xff] }
 0x15d   : > { %v1053_v31 = vmax.f32 %v1049_v27, 0.0  ;;  %1589 = vmatpush.bf16.msra.mxu2 %v3398_v17  ;;  %1605 = vmatpush.bf16.msra.mxu3 %v3404_v22  ;;  %v3403_v27 = vld [vmem:[#allocation5 + $0x100] sm:$0xff]  ;;  %v3421_v17 = vld [vmem:[#allocation3 + $0x190] sm:$0xff]  ;;  %v3430_v22 = vld [vmem:[#allocation3 + $0x1d8] sm:$0xff] }
 0x15e   : > { %1865 = vmatpush.bf16.msrb.mxu1 %v3421_v17  ;;  %v3443_v17 = vld [vmem:[#allocation5 + $0x180] sm:$0xff] }
 0x15f   : > { %v3888_v37 = vadd.f32 %v1053_v31, %v486_v34 }
 0x160   : > { %v1036_v30 = vpop.f32.mrf.mxu1 }
 0x161   : > { %v1037_v32 = vadd.f32 %v1036_v30, %v1023_v29  ;;  %v1057_v40 = vmax.f32 %v3888_v37, 0.0  ;;  %1590 = vmatpush.bf16.msra.mxu2 %v3397_v19  ;;  %1606 = vmatpush.bf16.msra.mxu3 %v3403_v27  ;;  %v3431_v19 = vld [vmem:[#allocation3 + $0x1e0] sm:$0xff] }
 0x162   : > { %1866 = vmatpush.bf16.msrb.mxu1 %v3420_v20  ;;  %v3451_v20 = vld [vmem:[#allocation5 + $0x1c0] sm:$0xff] }
 0x163   : > { %v1051_v35 = vadd.f32 %v1050_v33, %v1037_v32 }
 0x165   : > { %v1054_v38 = vmax.f32 %v1051_v35, 0.0  ;;  %1591 = vmatpush.bf16.msra.mxu2 %v3396_v21  ;;  %v3435_v21 = vld [vmem:[#allocation3 + $0x200] sm:$0xff] }
 0x167   : > { %v3890_v39 = vadd.f32 %v1054_v38, %v488_v36 }
 0x169   : > { %v1058_v41 = vmax.f32 %v3890_v39, 0.0  ;;  %1592 = vmatpush.bf16.msra.mxu2 %v3395_v23  ;;  %v3429_v23 = vld [vmem:[#allocation3 + $0x1d0] sm:$0xff] }
 0x16b   : > { %v3512_v42 = vpack.c.bf16 %v1058_v41, %v1057_v40 }
 0x16d   : > { %3562 = vst [vmem:[#allocation2 + $0x8] sm:$0xff] %v3512_v42   ;;  %1337 = vmatmul.bf16.vlgmr.msra.gmra.mxu1 %v3512_v42  ;;  %v3516_v45 = vunpack.c.l.b16 %v3512_v42  ;;  %1874 = vmatpush.bf16.msrb.mxu2 %v3434_v10  ;;  %v3445_v10 = vld [vmem:[#allocation5 + $0x190] sm:$0xff] }
 0x16f   : > { %v1132_v50 = vpack.c.b16 %v3516_v45, %v1130_v46  ;;  %v1126_v52 = vpack.c.b16 %v3516_v45, %v1123_v47  ;;  %v1400_v45 = vld [vmem:[#allocation2 + $0x4] sm:$0xc] }
 0x170   : > { %v1403_v46 = vld [vmem:[#allocation2 + $0x4] sm:$0x8] }
 0x171   : > { %v1135_v56 = vrot.slane %v1132_v50, 1  ;;  %v1146_v57 = vrot.slane %v1126_v52, 2  ;;  %1875 = vmatpush.bf16.msrb.mxu2 %v3433_v13  ;;  %v3444_v13 = vld [vmem:[#allocation5 + $0x188] sm:$0xff] }
 0x174   : > { %v1116_v48 = vld [vmem:[#allocation2 + $0xc] sm:$0x3] }
 0x175   : > { %v1118_v49 = vld [vmem:[#allocation2 + $0xc] sm:$0x7]  ;;  %v1125_v51 = vunpack.c.l.b16 %v1116_v48  ;;  %v1409_v48 = vunpack.c.l.b16 %v1400_v45  ;;  %1876 = vmatpush.bf16.msrb.mxu2 %v3432_v16  ;;  %v3453_v16 = vld [vmem:[#allocation5 + $0x1d0] sm:$0xff] }
 0x176   : > { %v1131_v53 = vunpack.c.l.b16 %v1118_v49  ;;  %v1416_v49 = vunpack.c.l.b16 %v1403_v46 }
 0x177   : > { %v1127_v54 = vpack.c.b16 %v1125_v51, %v1125_v51 }
 0x178   : > { %v1133_v55 = vpack.c.b16 %v1131_v53, %v1131_v53 }
 0x179   : > { %v1147_v58 = vrot.slane %v1127_v54, 2  ;;  %1877 = vmatpush.bf16.msrb.mxu2 %v3431_v19 }
 0x17a   : > { %v1136_v59 = vrot.slane %v1133_v55, 1 }
 0x17b   : > { %v1148_v60 = vsel %vm1145_vm2, %v1146_v57, %v1147_v58 }
 0x17c   : > { %v1137_v61 = vsel %vm1134_vm3, %v1135_v56, %v1136_v59  ;;  %v1150_v62 = vrot.slane %v1136_v59, 2  ;;  %1309 = vmatmul.bf16.vlgmr.msrb.gmra.mxu3 %v1148_v60 }
 0x17d   : > { %v1149_v63 = vrot.slane %v1137_v61, 2  ;;  %1888 = vmatpush.bf16.msrb.mxu3 %v3442_v3  ;;  %1878 = vmatpush.bf16.msrb.mxu2 %v3430_v22  ;;  %v3458_v3 = vld [vmem:[#allocation5 + $0x1f8] sm:$0xff] }
 0x17f   : > { %v1151_v0 = vsel %vm1145_vm2, %v1149_v63, %v1150_v62 }
 0x180   : > { %1323 = vmatmul.bf16.vlgmr.msra.gmra.mxu0 %v1151_v0 }
 0x181   : > { %1889 = vmatpush.bf16.msrb.mxu3 %v3441_v5  ;;  %1879 = vmatpush.bf16.msrb.mxu2 %v3429_v23  ;;  %v3462_v5 = vld [vmem:[#allocation5 + $0x218] sm:$0xff] }
 0x185   : > { %1890 = vmatpush.bf16.msrb.mxu3 %v3440_v7  ;;  %v3446_v7 = vld [vmem:[#allocation5 + $0x198] sm:$0xff] }
 0x189   : > { %1891 = vmatpush.bf16.msrb.mxu3 %v3439_v9  ;;  %v3456_v9 = vld [vmem:[#allocation5 + $0x1e8] sm:$0xff] }
 0x18d   : > { %1892 = vmatpush.bf16.msrb.mxu3 %v3438_v12  ;;  %v3455_v12 = vld [vmem:[#allocation5 + $0x1e0] sm:$0xff] }
 0x191   : > { %1893 = vmatpush.bf16.msrb.mxu3 %v3437_v15  ;;  %v3454_v15 = vld [vmem:[#allocation5 + $0x1d8] sm:$0xff] }
 0x195   : > { %1894 = vmatpush.bf16.msrb.mxu3 %v3436_v18  ;;  %v3452_v18 = vld [vmem:[#allocation5 + $0x1c8] sm:$0xff] }
 0x199   : > { %1895 = vmatpush.bf16.msrb.mxu3 %v3435_v21  ;;  %v3630_v21 = vld [vmem:[%s3951_s2 + $0x2] ss:$0 sm:$0xff] }
 0x1ea   : > { %v1338_v28 = vpop.f32.mrf.mxu1 }
 0x1f2   : > { %v1340_v36 = vpop.f32.mrf.mxu1 }
 0x1fd   : > { %v1324_v25 = vpop.f32.mrf.mxu0 }
 0x1ff   : > { %v1310_v26 = vpop.f32.mrf.mxu3 }
 0x200   : > { %v1311_v29 = vadd.f32 %v3628_v24, %v1310_v26  ;;  %v3428_v26 = vld [vmem:[#allocation3 + $0x1c8] sm:$0xff] }
 0x201   : > { %1880 = vmatpush.bf16.msrb.mxu2 %v3428_v26 }
 0x202   : > { %v1325_v30 = vadd.f32 %v1324_v25, %v1311_v29  ;;  %v3629_v25 = vld [vmem:[%s3953_s4 + $0x1] ss:$0 sm:$0xff]  ;;  %v3427_v29 = vld [vmem:[#allocation3 + $0x1c0] sm:$0xff] }
 0x204   : > { %v1339_v34 = vadd.f32 %v1338_v28, %v1325_v30 }
 0x205   : > { %v1326_v33 = vpop.f32.mrf.mxu0  ;;  %1881 = vmatpush.bf16.msrb.mxu2 %v3427_v29 }
 0x206   : > { %v1343_v42 = vmax.f32 %v1339_v34, 0.0 }
 0x207   : > { %v1312_v31 = vpop.f32.mrf.mxu3 }
 0x208   : > { %v1313_v32 = vadd.f32 %v3628_v24, %v1312_v31  ;;  %v3419_v24 = vld [vmem:[#allocation3 + $0x180] sm:$0xff] }
 0x209   : > { %1867 = vmatpush.bf16.msrb.mxu1 %v3419_v24 }
 0x20a   : > { %v1327_v35 = vadd.f32 %v1326_v33, %v1313_v32 }
 0x20c   : > { %v1341_v38 = vadd.f32 %v1340_v36, %v1327_v35 }
 0x20d   : > { %2145 = vmatpush.bf16.msra.mxu1 %v3458_v3  ;;  %v3478_v3 = vld [vmem:[#allocation7 + $0x58] sm:$0xff] }
 0x20e   : > { %v1344_v43 = vmax.f32 %v1341_v38, 0.0 }
 0x210   : > { %v3521_v44 = vpack.c.bf16 %v1344_v43, %v1343_v42 }
 0x211   : > { %2146 = vmatpush.bf16.msra.mxu1 %v3457_v6  ;;  %v3470_v6 = vld [vmem:[#allocation7 + $0x18] sm:$0xff] }
 0x212   : > { %3564 = vst [vmem:[#allocation2 + $0x8] sm:$0xff] %v3521_v44   ;;  %1621 = vmatmul.bf16.vlgmr.msrb.gmra.mxu0 %v3521_v44  ;;  %v3525_v47 = vunpack.c.l.b16 %v3521_v44 }
 0x214   : > { %v1412_v52 = vpack.c.b16 %v3525_v47, %v1409_v48  ;;  %v1418_v53 = vpack.c.b16 %v3525_v47, %v1416_v49  ;;  %v1688_v48 = vld [vmem:[#allocation2 + $0x4] sm:$0xf] }
 0x215   : > { %2147 = vmatpush.bf16.msra.mxu1 %v3456_v9  ;;  %v3476_v9 = vld [vmem:[#allocation7 + $0x48] sm:$0xff] }
 0x216   : > { %v1420_v58 = vrot.slane %v1418_v53, 1  ;;  %v1430_v59 = vrot.slane %v1412_v52, 2  ;;  %v1695_v52 = vunpack.c.l.b16 %v1688_v48 }
 0x219   : > { %v1402_v50 = vld [vmem:[#allocation2 + $0xc] sm:$0x3]  ;;  %2148 = vmatpush.bf16.msra.mxu1 %v3455_v12 }
 0x21a   : > { %v1404_v51 = vld [vmem:[#allocation2 + $0xc] sm:$0x7]  ;;  %v1411_v54 = vunpack.c.l.b16 %v1402_v50 }
 0x21b   : > { %v1417_v55 = vunpack.c.l.b16 %v1404_v51 }
 0x21c   : > { %v1413_v56 = vpack.c.b16 %v1411_v54, %v1411_v54 }
 0x21d   : > { %v1419_v57 = vpack.c.b16 %v1417_v55, %v1417_v55  ;;  %2149 = vmatpush.bf16.msra.mxu1 %v3454_v15  ;;  %v3468_v15 = vld [vmem:[#allocation7 + $0x8] sm:$0xff] }
 0x21e   : > { %v1431_v60 = vrot.slane %v1413_v56, 2 }
 0x21f   : > { %v1421_v61 = vrot.slane %v1419_v57, 1 }
 0x220   : > { %v1432_v62 = vsel %vm1145_vm2, %v1430_v59, %v1431_v60  ;;  %v3466_v60 = vld [vmem:[#allocation5 + $0x238] sm:$0xff] }
 0x221   : > { %v1422_v63 = vsel %vm1134_vm3, %v1420_v58, %v1421_v61  ;;  %v1434_v0 = vrot.slane %v1421_v61, 2  ;;  %1593 = vmatmul.bf16.vlgmr.msra.gmra.mxu2 %v1432_v62  ;;  %v3450_v61 = vld [vmem:[#allocation5 + $0x1b8] sm:$0xff]  ;;  %v3465_v62 = vld [vmem:[#allocation5 + $0x230] sm:$0xff]  ;;  %2150 = vmatpush.bf16.msra.mxu1 %v3453_v16 }
 0x222   : > { %v1433_v1 = vrot.slane %v1422_v63, 2  ;;  %2159 = vmatpush.bf16.msra.mxu2 %v3466_v60  ;;  %2131 = vmatpush.bf16.msra.mxu0 %v3450_v61  ;;  %v3449_v63 = vld [vmem:[#allocation5 + $0x1b0] sm:$0xff]  ;;  %v3480_v60 = vld [vmem:[#allocation7 + $0x68] sm:$0xff] }
 0x224   : > { %v1435_v2 = vsel %vm1145_vm2, %v1433_v1, %v1434_v0  ;;  %v3464_v0 = vld [vmem:[#allocation5 + $0x228] sm:$0xff] }
 0x225   : > { %1607 = vmatmul.bf16.vlgmr.msra.gmra.mxu3 %v1435_v2  ;;  %v3448_v1 = vld [vmem:[#allocation5 + $0x1a8] sm:$0xff]  ;;  %v3463_v2 = vld [vmem:[#allocation5 + $0x220] sm:$0xff]  ;;  %2151 = vmatpush.bf16.msra.mxu1 %v3452_v18 }
 0x226   : > { %2160 = vmatpush.bf16.msra.mxu2 %v3465_v62  ;;  %2132 = vmatpush.bf16.msra.mxu0 %v3449_v63  ;;  %v3473_v62 = vld [vmem:[#allocation7 + $0x30] sm:$0xff]  ;;  %v3487_v63 = vld [vmem:[#allocation7 + $0xa0] sm:$0xff] }
 0x229   : > { %2152 = vmatpush.bf16.msra.mxu1 %v3451_v20 }
 0x22a   : > { %2161 = vmatpush.bf16.msra.mxu2 %v3464_v0  ;;  %2133 = vmatpush.bf16.msra.mxu0 %v3448_v1  ;;  %v3479_v0 = vld [vmem:[#allocation7 + $0x60] sm:$0xff]  ;;  %v3472_v1 = vld [vmem:[#allocation7 + $0x28] sm:$0xff] }
 0x22e   : > { %2162 = vmatpush.bf16.msra.mxu2 %v3463_v2  ;;  %2134 = vmatpush.bf16.msra.mxu0 %v3447_v4  ;;  %v3486_v2 = vld [vmem:[#allocation7 + $0x98] sm:$0xff]  ;;  %v3471_v4 = vld [vmem:[#allocation7 + $0x20] sm:$0xff] }
 0x232   : > { %2163 = vmatpush.bf16.msra.mxu2 %v3462_v5  ;;  %2135 = vmatpush.bf16.msra.mxu0 %v3446_v7  ;;  %v3485_v5 = vld [vmem:[#allocation7 + $0x90] sm:$0xff] }
 0x233   : > { %v3477_v7 = vld [vmem:[#allocation7 + $0x50] sm:$0xff] }
 0x236   : > { %2164 = vmatpush.bf16.msra.mxu2 %v3461_v8  ;;  %2136 = vmatpush.bf16.msra.mxu0 %v3445_v10  ;;  %v3484_v8 = vld [vmem:[#allocation7 + $0x88] sm:$0xff]  ;;  %v3469_v10 = vld [vmem:[#allocation7 + $0x10] sm:$0xff] }
 0x23a   : > { %2165 = vmatpush.bf16.msra.mxu2 %v3460_v11  ;;  %2137 = vmatpush.bf16.msra.mxu0 %v3444_v13  ;;  %v3483_v11 = vld [vmem:[#allocation7 + $0x80] sm:$0xff]  ;;  %v3631_v13 = vld [vmem:[%s3953_s4 + $0x2] ss:$0 sm:$0xff] }
 0x23e   : > { %2166 = vmatpush.bf16.msra.mxu2 %v3459_v14  ;;  %2138 = vmatpush.bf16.msra.mxu0 %v3443_v17  ;;  %v3475_v14 = vld [vmem:[#allocation7 + $0x40] sm:$0xff] }
 0x28f   : > { %v1622_v30 = vpop.f32.mrf.mxu0 }
 0x297   : > { %v1624_v43 = vpop.f32.mrf.mxu0 }
 0x2a4   : > { %v1594_v27 = vpop.f32.mrf.mxu2 }
 0x2a5   : > { %v1595_v28 = vadd.f32 %v3629_v25, %v1594_v27 }
 0x2a8   : > { %v1608_v31 = vpop.f32.mrf.mxu3 }
 0x2a9   : > { %v1609_v32 = vadd.f32 %v1608_v31, %v1595_v28 }
 0x2ab   : > { %v1623_v33 = vadd.f32 %v1622_v30, %v1609_v32 }
 0x2ac   : > { %v1596_v34 = vpop.f32.mrf.mxu2 }
 0x2ad   : > { %v1597_v35 = vadd.f32 %v3629_v25, %v1596_v34  ;;  %v1627_v38 = vmax.f32 %v1623_v33, 0.0  ;;  %v1959_v33 = vld [vmem:[#allocation2 + $0x4] sm:$0xf] }
 0x2af   : > { %v3912_v45 = vadd.f32 %v1627_v38, %v1057_v40  ;;  %v1690_v40 = vld [vmem:[#allocation2 + $0x4] sm:$0xc]  ;;  %v1966_v38 = vunpack.c.l.b16 %v1959_v33 }
 0x2b0   : > { %v1610_v36 = vpop.f32.mrf.mxu3  ;;  %v1701_v54 = vunpack.c.l.b16 %v1690_v40 }
 0x2b1   : > { %v1611_v42 = vadd.f32 %v1610_v36, %v1597_v35  ;;  %v1631_v49 = vmax.f32 %v3912_v45, 0.0 }
 0x2b3   : > { %v1625_v44 = vadd.f32 %v1624_v43, %v1611_v42  ;;  %v1961_v43 = vld [vmem:[#allocation2 + $0x4] sm:$0xc] }
 0x2b5   : > { %v1628_v46 = vmax.f32 %v1625_v44, 0.0 }
 0x2b7   : > { %v3916_v47 = vadd.f32 %v1628_v46, %v1058_v41  ;;  %v1972_v46 = vunpack.c.l.b16 %v1961_v43 }
 0x2b9   : > { %v1632_v50 = vmax.f32 %v3916_v47, 0.0 }
 0x2bb   : > { %v3530_v51 = vpack.c.bf16 %v1632_v50, %v1631_v49 }
 0x2bd   : > { %3566 = vst [vmem:[#allocation2 + $0x8] sm:$0xff] %v3530_v51   ;;  %v3534_v37 = vunpack.c.l.b16 %v3530_v51  ;;  %1896 = vmatmul.bf16.vlgmr.msrb.gmra.mxu3 %v3530_v51 }
 0x2bf   : > { %v1697_v53 = vpack.c.b16 %v3534_v37, %v1695_v52  ;;  %v1703_v41 = vpack.c.b16 %v3534_v37, %v1701_v54 }
 0x2c1   : > { %1868 = vmatmul.bf16.vlgmr.msrb.gmra.mxu1 %v1697_v53  ;;  %v1705_v57 = vrot.slane %v1703_v41, 2  ;;  %v3482_v41 = vld [vmem:[#allocation7 + $0x78] sm:$0xff] }
 0x2c2   : > { %2468 = vmatpush.bf16.msrb.mxu0 %v3482_v41 }
 0x2c4   : > { %v1691_v39 = vld [vmem:[#allocation2 + $0xc] sm:$0x3] }
 0x2c5   : > { %v1702_v55 = vunpack.c.l.b16 %v1691_v39  ;;  %v3490_v39 = vld [vmem:[#allocation7 + $0xb8] sm:$0xff] }
 0x2c6   : > { %2482 = vmatpush.bf16.msrb.mxu1 %v3490_v39 }
 0x2c7   : > { %v1704_v56 = vpack.c.b16 %v1702_v55, %v1702_v55  ;;  %v3489_v55 = vld [vmem:[#allocation7 + $0xb0] sm:$0xff] }
 0x2c9   : > { %v1706_v58 = vrot.slane %v1704_v56, 2  ;;  %v3481_v56 = vld [vmem:[#allocation7 + $0x70] sm:$0xff] }
 0x2ca   : > { %2483 = vmatpush.bf16.msrb.mxu1 %v3489_v55  ;;  %2469 = vmatpush.bf16.msrb.mxu0 %v3481_v56  ;;  %v3579_v55 = vld [vmem:[#allocation2 + $0x4] sm:$0x8] }
 0x2cb   : > { %v1707_v59 = vsel %vm1145_vm2, %v1705_v57, %v1706_v58  ;;  %v3474_v57 = vld [vmem:[#allocation7 + $0x38] sm:$0xff]  ;;  %v3488_v58 = vld [vmem:[#allocation7 + $0xa8] sm:$0xff] }
 0x2cc   : > { %1882 = vmatmul.bf16.vlgmr.msrb.gmra.mxu2 %v1707_v59  ;;  %2454 = vmatpush.bf16.msra.mxu3 %v3474_v57  ;;  %v391_v59 = vld [vmem:[#allocation2 + $0x10] sm:$0x1] }
 0x2cd   : > { %v392_v61 = vsel %vm390_vm6, 0, %v391_v59 }
 0x2ce   : > { %2484 = vmatpush.bf16.msrb.mxu1 %v3488_v58  ;;  %393 = vst [vmem:[#allocation2 + $0x10] sm:$0x1] %v392_v61  ;;  %2470 = vmatpush.bf16.msrb.mxu0 %v3480_v60 }
 0x2d0   : > { %2455 = vmatpush.bf16.msra.mxu3 %v3473_v62 }
 0x2d2   : > { %2485 = vmatpush.bf16.msrb.mxu1 %v3487_v63  ;;  %2471 = vmatpush.bf16.msrb.mxu0 %v3479_v0 }
 0x2d4   : > { %2456 = vmatpush.bf16.msra.mxu3 %v3472_v1 }
 0x2d6   : > { %2486 = vmatpush.bf16.msrb.mxu1 %v3486_v2  ;;  %2472 = vmatpush.bf16.msrb.mxu0 %v3478_v3 }
 0x2d8   : > { %2457 = vmatpush.bf16.msra.mxu3 %v3471_v4 }
 0x2da   : > { %2487 = vmatpush.bf16.msrb.mxu1 %v3485_v5  ;;  %2473 = vmatpush.bf16.msrb.mxu0 %v3477_v7 }
 0x2dc   : > { %2458 = vmatpush.bf16.msra.mxu3 %v3470_v6 }
 0x2de   : > { %2488 = vmatpush.bf16.msrb.mxu1 %v3484_v8  ;;  %2474 = vmatpush.bf16.msrb.mxu0 %v3476_v9 }
 0x2e0   : > { %2459 = vmatpush.bf16.msra.mxu3 %v3469_v10 }
 0x2e2   : > { %2489 = vmatpush.bf16.msrb.mxu1 %v3483_v11  ;;  %2475 = vmatpush.bf16.msrb.mxu0 %v3475_v14  ;;  %v3632_v14 = vld [vmem:[%s3957_s8] ss:$0 sm:$0xff] }
 0x2e4   : > { %2460 = vmatpush.bf16.msra.mxu3 %v3468_v15 }
 0x33e   : > { %v1869_v19 = vpop.f32.mrf.mxu1 }
 0x33f   : > { %v1870_v24 = vadd.f32 %v3630_v21, %v1869_v19  ;;  %v3467_v19 = vld [vmem:[#allocation7] sm:$0xff] }
 0x340   : > { %v1897_v22 = vpop.f32.mrf.mxu3  ;;  %2461 = vmatpush.bf16.msra.mxu3 %v3467_v19 }
 0x346   : > { %v1871_v25 = vpop.f32.mrf.mxu1 }
 0x347   : > { %v1872_v27 = vadd.f32 %v3630_v21, %v1871_v25  ;;  %v2235_v25 = vld [vmem:[#allocation2 + $0x10] sm:$0x1] }
 0x348   : > { %v1899_v31 = vpop.f32.mrf.mxu3 }
 0x34f   : > { %v1883_v23 = vpop.f32.mrf.mxu2 }
 0x350   : > { %v1884_v26 = vadd.f32 %v1883_v23, %v1870_v24 }
 0x352   : > { %v1898_v29 = vadd.f32 %v1897_v22, %v1884_v26 }
 0x354   : > { %v1902_v34 = vmax.f32 %v1898_v29, 0.0 }
 0x357   : > { %v1885_v28 = vpop.f32.mrf.mxu2 }
 0x358   : > { %v1886_v30 = vadd.f32 %v1885_v28, %v1872_v27 }
 0x35a   : > { %v1900_v32 = vadd.f32 %v1899_v31, %v1886_v30  ;;  %v2254_v30 = vunpack.c.l.b16 %v2235_v25 }
 0x35c   : > { %v1903_v35 = vmax.f32 %v1900_v32, 0.0 }
 0x35e   : > { %v3539_v36 = vpack.c.bf16 %v1903_v35, %v1902_v34  ;;  %v2255_v34 = vpack.c.b16 %v2254_v30, %v2254_v30 }
 0x360   : > { %3568 = vst [vmem:[#allocation2 + $0x8] sm:$0xff] %v3539_v36   ;;  %v3543_v42 = vunpack.c.l.b16 %v3539_v36  ;;  %2167 = vmatmul.bf16.vlgmr.msra.gmra.mxu2 %v3539_v36 }
 0x362   : > { %v1968_v44 = vpack.c.b16 %v3543_v42, %v1966_v38  ;;  %v1974_v51 = vpack.c.b16 %v3543_v42, %v1972_v46  ;;  %v2258_v42 = vrot.slane %v2255_v34, 5 }
 0x364   : > { %2139 = vmatmul.bf16.vlgmr.msra.gmra.mxu0 %v1968_v44  ;;  %v1976_v40 = vrot.slane %v1974_v51, 2 }
 0x367   : > { %v1962_v48 = vld [vmem:[#allocation2 + $0xc] sm:$0x3] }
 0x368   : > { %v1973_v52 = vunpack.c.l.b16 %v1962_v48 }
 0x36a   : > { %v1975_v37 = vpack.c.b16 %v1973_v52, %v1973_v52 }
 0x36c   : > { %v1977_v53 = vrot.slane %v1975_v37, 2 }
 0x36e   : > { %v1978_v54 = vsel %vm1145_vm2, %v1976_v40, %v1977_v53 }
 0x36f   : > { %2153 = vmatmul.bf16.vlgmr.msra.gmra.mxu1 %v1978_v54 }
 0x3e1   : > { %v2140_v12 = vpop.f32.mrf.mxu0 }
 0x3e2   : > { %v2141_v16 = vadd.f32 %v3631_v13, %v2140_v12 }
 0x3e3   : > { %v2168_v17 = vpop.f32.mrf.mxu2 }
 0x3e9   : > { %v2142_v21 = vpop.f32.mrf.mxu0 }
 0x3ea   : > { %v2143_v23 = vadd.f32 %v3631_v13, %v2142_v21 }
 0x3eb   : > { %v2170_v28 = vpop.f32.mrf.mxu2 }
 0x3ec   : > { %v2154_v18 = vpop.f32.mrf.mxu1 }
 0x3ed   : > { %v2155_v20 = vadd.f32 %v2154_v18, %v2141_v16 }
 0x3ef   : > { %v2169_v22 = vadd.f32 %v2168_v17, %v2155_v20 }
 0x3f1   : > { %v2173_v26 = vmax.f32 %v2169_v22, 0.0 }
 0x3f3   : > { %v2175_v31 = vadd.f32 %v2173_v26, %v1631_v49 }
 0x3f4   : > { %v2156_v24 = vpop.f32.mrf.mxu1 }
 0x3f5   : > { %v2157_v27 = vadd.f32 %v2156_v24, %v2143_v23  ;;  %v2177_v35 = vmax.f32 %v2175_v31, 0.0 }
 0x3f7   : > { %v2171_v29 = vadd.f32 %v2170_v28, %v2157_v27 }
 0x3f9   : > { %v2174_v32 = vmax.f32 %v2171_v29, 0.0 }
 0x3fb   : > { %v2176_v33 = vadd.f32 %v2174_v32, %v1632_v50 }
 0x3fd   : > { %v2178_v36 = vmax.f32 %v2176_v33, 0.0 }
 0x3ff   : > { %v3548_v38 = vpack.c.bf16 %v2178_v36, %v2177_v35 }
 0x401   : > { %3570 = vst [vmem:[#allocation2 + $0x8] sm:$0xff] %v3548_v38   ;;  %v2257_v43 = vrot.slane %v3548_v38, 5  ;;  %v3553_v44 = vunpack.c.h.b16 %v3548_v38  ;;  %v2246_v46 = vshrl.u32 %v3548_v38, 16  ;;  %v2249_v48 = vshll.u32 %v3548_v38, 16 }
 0x403   : > { %v2259_v51 = vsel %vm2256_vm7, %v2257_v43, %v2258_v42  ;;  %v2291_v52 = vshrl.u32 %v2257_v43, 16  ;;  %v2294_v37 = vshll.u32 %v2257_v43, 16  ;;  %v2243_v45 = vpack.c.b16 %v3553_v44, %v3553_v44 }
 0x404   : > { %v2299_v49 = vshrl.u32 %v2259_v51, 16  ;;  %v2302_v40 = vshll.u32 %v2259_v51, 16  ;;  %v2248_v53 = vrot.slane %v2246_v46, 4  ;;  %v2251_v47 = vrot.slane %v2249_v48, 5 }
 0x405   : > { %v2293_v50 = vrot.slane %v2291_v52, 3  ;;  %v2296_v54 = vrot.slane %v2294_v37, 4  ;;  %v2273_v58 = vshrl.u32 %v2243_v45, 16  ;;  %v2276_v59 = vshll.u32 %v2243_v45, 16 }
 0x406   : > { %v2301_v39 = vrot.slane %v2299_v49, 3  ;;  %v2304_v41 = vrot.slane %v2302_v40, 4  ;;  %v2252_v56 = vor.u32 %v2251_v47, %v2248_v53 }
 0x407   : > { %v2297_v57 = vor.u32 %v2296_v54, %v2293_v50  ;;  %v2275_v6 = vrot.slane %v2273_v58, 3  ;;  %v2278_v7 = vrot.slane %v2276_v59, 4 }
 0x408   : > { %v2305_v60 = vor.u32 %v2304_v41, %v2301_v39  ;;  %v3582_v61 = vld [vmem:[#allocation2 + $0x4] sm:$0xf0]   ;;  %v2282_v62 = vshrl.u32 %v2252_v56, 16  ;;  %v2285_v63 = vshll.u32 %v2252_v56, 16 }
 0x409   : > { %v3580_v0 = vor.u32 %v3582_v61, %v3579_v55  ;;  %v2279_v12 = vor.u32 %v2278_v7, %v2275_v6 }
 0x40a   : > { %v2306_v1 = vsel %vm2263_vm8, %v2297_v57, %v2305_v60  ;;  %v2284_v2 = vrot.slane %v2282_v62, 3  ;;  %v2287_v3 = vrot.slane %v2285_v63, 4 }
 0x40b   : > { %2490 = vmatmul.bf16.vlgmr.msrb.gmra.mxu1 %v2306_v1  ;;  %v2265_v4 = vshrl.u32 %v3580_v0, 16  ;;  %v2268_v5 = vshll.u32 %v3580_v0, 16 }
 0x40c   : > { %v2288_v8 = vor.u32 %v2287_v3, %v2284_v2 }
 0x40d   : > { %v2267_v9 = vrot.slane %v2265_v4, 3  ;;  %v2270_v10 = vrot.slane %v2268_v5, 4 }
 0x40e   : > { %2476 = vmatmul.bf16.vlgmr.msrb.gmra.mxu0 %v2288_v8 }
 0x40f   : > { %v2271_v11 = vor.u32 %v2270_v10, %v2267_v9 }
 0x411   : > { %v2280_v13 = vsel %vm2263_vm8, %v2271_v11, %v2279_v12 }
 0x412   : > { %2462 = vmatmul.bf16.vlgmr.msra.gmra.mxu3 %v2280_v13 }
 0x488   : > { %v2491_v18 = vpop.f32.mrf.mxu1 }
 0x48b   : > { %v2477_v15 = vpop.f32.mrf.mxu0 }
 0x490   : > { %v2493_v25 = vpop.f32.mrf.mxu1 }
 0x493   : > { %v2479_v23 = vpop.f32.mrf.mxu0 }
 0x495   : > { %v2463_v16 = vpop.f32.mrf.mxu3 }
 0x496   : > { %v2464_v17 = vadd.f32 %v3632_v14, %v2463_v16 }
 0x498   : > { %v2478_v19 = vadd.f32 %v2477_v15, %v2464_v17 }
 0x49a   : > { %v2492_v20 = vadd.f32 %v2491_v18, %v2478_v19 }
 0x49c   : > { %2496 = vst [vmem:[%s382_s12] sm:$0xff] %v2492_v20 }
 0x49d   : > { %v2465_v21 = vpop.f32.mrf.mxu3 }
 0x49e   : > { %v2466_v22 = vadd.f32 %v3632_v14, %v2465_v21 }
 0x4a0   : > { %v2480_v24 = vadd.f32 %v2479_v23, %v2466_v22 }
 0x4a2   : > { %v2494_v26 = vadd.f32 %v2493_v25, %v2480_v24 }
 0x4a4   : > { %2497 = vst [vmem:[%s382_s12 + $0x8] sm:$0xff] %v2494_v26 }
 0x4a5 PF: > { %s21_s30 = sadd.s32 1, %s3737_s30  }
 0x4a6   : > { %p18_p7 = scmp.ge.s32.totalorder %s21_s30, 4  }
 0x4a8   :  { %20 = sbr.rel (!%p18_p7) target bundleno = 2 (0x2), region = 107 }
 0x4ad   :  { %2519 = vsyncpa [#allocation4], 1 }
 0x4ae   :  { %2521 = vsyncpa [#allocation4 + $0x1], 1 }
 0x4af   :  { %2522 = vsyncpa [#allocation6], 1 }

</bundles_post_ra>
